<compile_context>
chip_gen: v7x
topology: tpu7x:2x2x1
jax: 0.10.0
libtpu: 0.0.40
codegen_flags: <defaults>
</compile_context>

<pallas_src>
import math
import numpy as np
import jax
import jax.numpy as jnp
from jax.experimental import pallas as pl
from jax.experimental.pallas import tpu as pltpu  # noqa: F401

# ---- model hyper-parameters (small, consistent with the module) ----
B, S = 2, 8
D_MODEL = 32
HEADS = 4
D_K = D_MODEL // HEADS
D_FF = 4 * D_MODEL
N_LAYERS = 2
VOCAB = 64
VOCAB_PAD = 128          # lane-dense output slab (>= VOCAB, multiple of 128)
EPS = 1e-6
NEG_INF = -1e9

# ---- packed-slab layout constants ----
# wrow slab: (D_MODEL, 768)  [wvo_0 | wvo_1 | w1_0 | w1_1 | w_out_pad | wqk_0 | wqk_1]
OFF_WVO = 0
OFF_W1 = N_LAYERS * HEADS * D_MODEL                     # 256
OFF_WOUT = OFF_W1 + N_LAYERS * D_FF                     # 512
OFF_WQK = OFF_WOUT + VOCAB_PAD                          # 640
WROW_WIDTH = OFF_WQK + N_LAYERS * 2 * D_MODEL           # 768

# wcol slab: (VOCAB + N_LAYERS*D_FF, D_MODEL)  [embed ; w2_0 ; w2_1]
WCOL_ROWS = VOCAB + N_LAYERS * D_FF                     # 320

# vec slab: (24, 128) rows of LN params / biases (padded to 128 lanes)
ROWS_PER_LAYER = 9
R_LN1A, R_LN1B, R_BQK, R_BVO, R_BO, R_LN3A, R_LN3B, R_B1, R_B2 = range(9)
R_NORMA = N_LAYERS * ROWS_PER_LAYER                     # 18
R_NORMB = R_NORMA + 1
R_BOUT = R_NORMA + 2
VEC_ROWS = 24


# --------------------------------------------------------------------------
# in-kernel helpers
# --------------------------------------------------------------------------
def _layer_norm(v, alpha, bias):
    # matches Norm: alpha * (x - mean) / (std + eps) + bias, torch.std is unbiased (D-1)
    mean = jnp.mean(v, axis=-1, keepdims=True)
    diff = v - mean
    var = jnp.sum(diff * diff, axis=-1, keepdims=True) / float(v.shape[-1] - 1)
    std = jnp.sqrt(var)
    return alpha * diff / (std + EPS) + bias


# --------------------------------------------------------------------------
# fused forward kernel (single invocation, everything resident in VMEM)
# --------------------------------------------------------------------------
def fused_forward_kernel(ids_ref, pm_ref, wrow_ref, wcol_ref, vec_ref, o_ref):
    bs = ids_ref.shape[0]            # B*S

    vec = vec_ref[...]               # (24, 128) -- all LN params / biases, one tiny load

    # ---- Embedder (one-hot matmul == exact row gather) + PositionalEncoder ----
    ids = ids_ref[...]                                                # (BS, 1) int32
    vocab_iota = jax.lax.broadcasted_iota(jnp.int32, (bs, VOCAB), 1)  # (BS, VOCAB)
    one_hot = jnp.where(vocab_iota == ids, 1.0, 0.0).astype(jnp.float32)
    embed = wcol_ref[0:VOCAB, :]                                      # (VOCAB, D)
    pe = pm_ref[:, 0:D_MODEL]                                         # (BS, D)
    x = jnp.dot(one_hot, embed, preferred_element_type=jnp.float32) * math.sqrt(D_MODEL) + pe

    mask = pm_ref[:, D_MODEL:D_MODEL + bs]                            # (BS, BS) additive bias

    for li in range(N_LAYERS):
        r = li * ROWS_PER_LAYER
        ln1a = vec[r + R_LN1A:r + R_LN1A + 1, :D_MODEL]
        ln1b = vec[r + R_LN1B:r + R_LN1B + 1, :D_MODEL]
        bqk = vec[r + R_BQK:r + R_BQK + 1, :2 * D_MODEL]
        bvo = vec[r + R_BVO:r + R_BVO + 1, :HEADS * D_MODEL]
        bo = vec[r + R_BO:r + R_BO + 1, :D_MODEL]
        ln3a = vec[r + R_LN3A:r + R_LN3A + 1, :D_MODEL]
        ln3b = vec[r + R_LN3B:r + R_LN3B + 1, :D_MODEL]
        b1 = vec[r + R_B1:r + R_B1 + 1, :D_FF]
        b2 = vec[r + R_B2:r + R_B2 + 1, :D_MODEL]

        wqk = wrow_ref[:, OFF_WQK + li * 2 * D_MODEL:OFF_WQK + (li + 1) * 2 * D_MODEL]
        wvo = wrow_ref[:, OFF_WVO + li * HEADS * D_MODEL:OFF_WVO + (li + 1) * HEADS * D_MODEL]
        w1 = wrow_ref[:, OFF_W1 + li * D_FF:OFF_W1 + (li + 1) * D_FF]
        w2 = wcol_ref[VOCAB + li * D_FF:VOCAB + (li + 1) * D_FF, :]

        # ---- self-attention sublayer: x = x + MHA(norm_1(x)) ----
        x2 = _layer_norm(x, ln1a, ln1b)
        qk = jnp.dot(x2, wqk, preferred_element_type=jnp.float32) + bqk   # (BS, 2D), Q pre-scaled
        vp = jnp.dot(x2, wvo, preferred_element_type=jnp.float32) + bvo   # (BS, HEADS*D) = V@Wo folded
        q = qk[:, :D_MODEL]
        k = qk[:, D_MODEL:2 * D_MODEL]

        attn = jnp.zeros((bs, D_MODEL), jnp.float32)
        for h in range(HEADS):
            qh = q[:, h * D_K:(h + 1) * D_K]
            kh = k[:, h * D_K:(h + 1) * D_K]
            vh = vp[:, h * D_MODEL:(h + 1) * D_MODEL]                 # (BS, D): head already @ Wo_h
            s = jnp.dot(qh, kh.T, preferred_element_type=jnp.float32) + mask
            s = s - jnp.max(s, axis=-1, keepdims=True)
            p = jnp.exp(s)
            p = p * pl.reciprocal(jnp.sum(p, axis=-1, keepdims=True), approx=True)
            attn = attn + jnp.dot(p, vh, preferred_element_type=jnp.float32)
        x = x + attn + bo

        # ---- feed-forward sublayer: x = x + FF(norm_3(x)) ----
        x2 = _layer_norm(x, ln3a, ln3b)
        h1 = jnp.maximum(jnp.dot(x2, w1, preferred_element_type=jnp.float32) + b1, 0.0)
        x = x + jnp.dot(h1, w2, preferred_element_type=jnp.float32) + b2

    # ---- final decoder Norm + out Linear (vocab padded to 128 lanes) + log_softmax ----
    xn = _layer_norm(x,
                     vec[R_NORMA:R_NORMA + 1, :D_MODEL],
                     vec[R_NORMB:R_NORMB + 1, :D_MODEL])
    wout = wrow_ref[:, OFF_WOUT:OFF_WOUT + VOCAB_PAD]
    bout = vec[R_BOUT:R_BOUT + 1, :]                                  # pad lanes carry -1e9
    logits = jnp.dot(xn, wout, preferred_element_type=jnp.float32) + bout
    m = jnp.max(logits, axis=-1, keepdims=True)
    z = logits - m
    lse = jnp.log(jnp.sum(jnp.exp(z), axis=-1, keepdims=True))
    o_ref[...] = z - lse                                              # (BS, VOCAB_PAD)


# --------------------------------------------------------------------------
# parameters (deterministic, in-script)
# --------------------------------------------------------------------------
def make_positional_encoding(max_len, d_model):
    pe = np.zeros((max_len, d_model), dtype=np.float32)
    for pos in range(max_len):
        for i in range(0, d_model, 2):
            pe[pos, i] = math.sin(pos / (10000 ** ((2 * i) / d_model)))
            pe[pos, i + 1] = math.cos(pos / (10000 ** ((2 * (i + 1)) / d_model)))
    return jnp.asarray(pe)


def init_params(key):
    def nrm(k, shape, scale=0.02):
        return scale * jax.random.normal(k, shape, dtype=jnp.float32)

    keys = jax.random.split(key, 2 + N_LAYERS)
    wq, wk, wv, wo, w1, w2 = [], [], [], [], [], []
    for li in range(N_LAYERS):
        lk = jax.random.split(keys[2 + li], 6)
        wq.append(nrm(lk[0], (D_MODEL, D_MODEL)))
        wk.append(nrm(lk[1], (D_MODEL, D_MODEL)))
        wv.append(nrm(lk[2], (D_MODEL, D_MODEL)))
        wo.append(nrm(lk[3], (D_MODEL, D_MODEL)))
        w1.append(nrm(lk[4], (D_MODEL, D_FF)))
        w2.append(nrm(lk[5], (D_FF, D_MODEL)))

    return {
        "embed": nrm(keys[0], (VOCAB, D_MODEL), scale=1.0),
        "pe": make_positional_encoding(64, D_MODEL),
        "ln1_a": jnp.ones((N_LAYERS, 1, D_MODEL), jnp.float32),
        "ln1_b": jnp.zeros((N_LAYERS, 1, D_MODEL), jnp.float32),
        "wq": jnp.stack(wq), "bq": jnp.zeros((N_LAYERS, 1, D_MODEL), jnp.float32),
        "wk": jnp.stack(wk), "bk": jnp.zeros((N_LAYERS, 1, D_MODEL), jnp.float32),
        "wv": jnp.stack(wv), "bv": jnp.zeros((N_LAYERS, 1, D_MODEL), jnp.float32),
        "wo": jnp.stack(wo), "bo": jnp.zeros((N_LAYERS, 1, D_MODEL), jnp.float32),
        "ln3_a": jnp.ones((N_LAYERS, 1, D_MODEL), jnp.float32),
        "ln3_b": jnp.zeros((N_LAYERS, 1, D_MODEL), jnp.float32),
        "w1": jnp.stack(w1), "b1": jnp.zeros((N_LAYERS, 1, D_FF), jnp.float32),
        "w2": jnp.stack(w2), "b2": jnp.zeros((N_LAYERS, 1, D_MODEL), jnp.float32),
        "norm_a": jnp.ones((1, D_MODEL), jnp.float32),
        "norm_b": jnp.zeros((1, D_MODEL), jnp.float32),
        "w_out": nrm(keys[1], (D_MODEL, VOCAB)),
        "b_out": jnp.zeros((1, VOCAB), jnp.float32),
    }


# --------------------------------------------------------------------------
# one-time packing: fold scales, fold Wo into Wv, build mask/pe, pack slabs
# --------------------------------------------------------------------------
def pack_inputs(params, trg_mask):
    b, s, _ = trg_mask.shape
    bs = b * s
    scale = 1.0 / math.sqrt(D_K)

    # additive attention bias: 0 where allowed, -1e9 where masked; block-diagonal
    # over the batch so the whole (B*S) batch is handled in one attention step.
    bias = jnp.where(trg_mask == 0.0, jnp.float32(NEG_INF), jnp.float32(0.0))   # (B,S,S)
    same_b = (jnp.arange(b)[:, None, None, None] ==
              jnp.arange(b)[None, None, :, None])                               # (B,1,B,1)
    mask_big = jnp.where(same_b, bias[:, :, None, :],
                         jnp.float32(NEG_INF)).reshape(bs, bs)                  # (BS, BS)
    pe_bs = jnp.tile(params["pe"][:s], (b, 1))                                  # (BS, D)
    pm = jnp.concatenate([pe_bs, mask_big], axis=1)                             # (BS, D+BS)

    # row-32 weight slab: wvo (V@Wo folded, per head), w1, padded w_out, merged+scaled wq|wk
    wvo_l, w1_l, wqk_l = [], [], []
    for li in range(N_LAYERS):
        wv_li, wo_li = params["wv"][li], params["wo"][li]
        wvo = jnp.concatenate(
            [wv_li[:, h * D_K:(h + 1) * D_K] @ wo_li[h * D_K:(h + 1) * D_K, :]
             for h in range(HEADS)], axis=1)                                    # (D, HEADS*D)
        wvo_l.append(wvo)
        w1_l.append(params["w1"][li])
        wqk_l.append(jnp.concatenate([params["wq"][li] * scale, params["wk"][li]], axis=1))
    w_out_p = jnp.pad(params["w_out"], ((0, 0), (0, VOCAB_PAD - VOCAB)))
    wrow = jnp.concatenate(wvo_l + w1_l + [w_out_p] + wqk_l, axis=1)            # (D, 768)
    assert wrow.shape == (D_MODEL, WROW_WIDTH)

    # col-32 weight slab: embed ; w2 per layer
    wcol = jnp.concatenate([params["embed"]] + [params["w2"][li] for li in range(N_LAYERS)],
                           axis=0)                                              # (320, D)
    assert wcol.shape == (WCOL_ROWS, D_MODEL)

    # vector slab: all LN params / biases (lane-padded to 128)
    vec = jnp.zeros((VEC_ROWS, VOCAB_PAD), jnp.float32)
    for li in range(N_LAYERS):
        r = li * ROWS_PER_LAYER
        vec = vec.at[r + R_LN1A, :D_MODEL].set(params["ln1_a"][li, 0])
        vec = vec.at[r + R_LN1B, :D_MODEL].set(params["ln1_b"][li, 0])
        vec = vec.at[r + R_BQK, :D_MODEL].set(params["bq"][li, 0] * scale)
        vec = vec.at[r + R_BQK, D_MODEL:2 * D_MODEL].set(params["bk"][li, 0])
        bv_li, wo_li = params["bv"][li, 0], params["wo"][li]
        bvo = jnp.concatenate(
            [bv_li[h * D_K:(h + 1) * D_K] @ wo_li[h * D_K:(h + 1) * D_K, :]
             for h in range(HEADS)], axis=0)                                    # (HEADS*D,)
        vec = vec.at[r + R_BVO, :HEADS * D_MODEL].set(bvo)
        vec = vec.at[r + R_BO, :D_MODEL].set(params["bo"][li, 0])
        vec = vec.at[r + R_LN3A, :D_MODEL].set(params["ln3_a"][li, 0])
        vec = vec.at[r + R_LN3B, :D_MODEL].set(params["ln3_b"][li, 0])
        vec = vec.at[r + R_B1, :D_FF].set(params["b1"][li, 0])
        vec = vec.at[r + R_B2, :D_MODEL].set(params["b2"][li, 0])
    vec = vec.at[R_NORMA, :D_MODEL].set(params["norm_a"][0])
    vec = vec.at[R_NORMB, :D_MODEL].set(params["norm_b"][0])
    b_out_p = jnp.full((VOCAB_PAD,), NEG_INF, jnp.float32).at[:VOCAB].set(params["b_out"][0])
    vec = vec.at[R_BOUT, :].set(b_out_p)   # pad logits get -1e9 -> log_softmax unchanged

    return pm, wrow, wcol, vec


# --------------------------------------------------------------------------
# forward pass (is_lm=True path of Transformer.forward) -- one pallas_call
# --------------------------------------------------------------------------
def transformer_forward(trg, packed):
    pm, wrow, wcol, vec = packed
    b, s = trg.shape
    bs = b * s
    ids = trg.reshape(bs, 1).astype(jnp.int32)

    logp_pad = pl.pallas_call(
        fused_forward_kernel,
        out_shape=jax.ShapeDtypeStruct((bs, VOCAB_PAD), jnp.float32),
    )(ids, pm, wrow, wcol, vec)

    aux_loss = jnp.float32(0.0)      # mixing='none' -> no auxiliary loss
    final_output = logp_pad[:, :VOCAB].reshape(b, s, VOCAB)
    return final_output, aux_loss


# --------------------------------------------------------------------------
# pure-JAX reference (unfused) for a numerical sanity check
# --------------------------------------------------------------------------
def reference_forward(trg, trg_mask, params):
    b, s = trg.shape
    scale = 1.0 / math.sqrt(D_K)

    def norm(v, a, bb):
        mean = jnp.mean(v, -1, keepdims=True)
        diff = v - mean
        var = jnp.sum(diff * diff, -1, keepdims=True) / (v.shape[-1] - 1)
        return a * diff / (jnp.sqrt(var) + EPS) + bb

    x = params["embed"][trg] * math.sqrt(D_MODEL) + params["pe"][:s][None]
    maskb = jnp.where(trg_mask == 0.0, jnp.float32(NEG_INF), jnp.float32(0.0))[:, None]
    for li in range(N_LAYERS):
        x2 = norm(x, params["ln1_a"][li], params["ln1_b"][li])
        q = (x2 @ params["wq"][li] + params["bq"][li]).reshape(b, s, HEADS, D_K).transpose(0, 2, 1, 3)
        k = (x2 @ params["wk"][li] + params["bk"][li]).reshape(b, s, HEADS, D_K).transpose(0, 2, 1, 3)
        v = (x2 @ params["wv"][li] + params["bv"][li]).reshape(b, s, HEADS, D_K).transpose(0, 2, 1, 3)
        sc = jnp.einsum('bhqd,bhkd->bhqk', q, k) * scale + maskb
        p = jax.nn.softmax(sc, axis=-1)
        o = jnp.einsum('bhqk,bhkd->bhqd', p, v).transpose(0, 2, 1, 3).reshape(b, s, D_MODEL)
        x = x + o @ params["wo"][li] + params["bo"][li]
        x2 = norm(x, params["ln3_a"][li], params["ln3_b"][li])
        h1 = jax.nn.relu(x2 @ params["w1"][li] + params["b1"][li])
        x = x + h1 @ params["w2"][li] + params["b2"][li]
    xn = norm(x, params["norm_a"], params["norm_b"])
    logits = xn @ params["w_out"] + params["b_out"]
    return jax.nn.log_softmax(logits, axis=-1)


if __name__ == "__main__":
    key = jax.random.PRNGKey(0)
    pkey, tkey = jax.random.split(key)
    params = init_params(pkey)

    # deterministic example inputs
    trg = jax.random.randint(tkey, (B, S), 0, VOCAB, dtype=jnp.int32)
    src = jnp.zeros((B, S), jnp.int32)           # unused: is_lm=True, e_outputs=None
    causal = jnp.tril(jnp.ones((S, S), jnp.float32))
    trg_mask = jnp.broadcast_to(causal, (B, S, S))
    src_mask = None                              # unused for is_lm=True

    # one-time host-side packing (mask, pe tiling, scale/Wo folding, vocab padding)
    packed = pack_inputs(params, trg_mask)

    fwd = jax.jit(transformer_forward)
    logp, aux = fwd(trg, packed)
    jax.block_until_ready(logp)
    jax.block_until_ready(aux)

    # sanity: shape, no NaNs (mirrors is_debug check), proper log_softmax, matches ref
    assert logp.shape == (B, S, VOCAB)
    assert not bool(jnp.any(jnp.isnan(logp)))
    assert bool(jnp.allclose(jnp.sum(jnp.exp(logp), axis=-1), 1.0, atol=1e-4))
    ref = reference_forward(trg, trg_mask, params)
    assert bool(jnp.allclose(logp, ref, atol=2e-2)), float(jnp.max(jnp.abs(logp - ref)))
    print("KERNEL_OK")
</pallas_src>

<mosaic_0001>
module attributes {stable_mosaic.version = 11 : i64} {
  func.func @fused_forward_kernel(%arg0: memref<16x1xi32, #tpu.memory_space<vmem>>, %arg1: memref<16x48xf32, #tpu.memory_space<vmem>>, %arg2: memref<32x768xf32, #tpu.memory_space<vmem>>, %arg3: memref<320x32xf32, #tpu.memory_space<vmem>>, %arg4: memref<24x128xf32, #tpu.memory_space<vmem>>, %arg5: memref<16x128xf32, #tpu.memory_space<vmem>>) attributes {dimension_semantics = [], scalar_prefetch = 0 : i64, scratch_operands = 0 : i64, tpu.core_type = #tpu.core_type<tc>} {
    %c0 = arith.constant 0 : index
    %c0_0 = arith.constant 0 : index
    %0 = vector.load %arg4[%c0, %c0_0] : memref<24x128xf32, #tpu.memory_space<vmem>>, vector<24x128xf32>
    %c0_1 = arith.constant 0 : index
    %c0_2 = arith.constant 0 : index
    %1 = vector.load %arg0[%c0_1, %c0_2] : memref<16x1xi32, #tpu.memory_space<vmem>>, vector<16x1xi32>
    %2 = tpu.iota {dimensions = array<i32: 1>} : vector<16x64xi32>
    %3 = vector.broadcast %1 : vector<16x1xi32> to vector<16x64xi32>
    %4 = arith.cmpi eq, %2, %3 : vector<16x64xi32>
    %cst = arith.constant 1.000000e+00 : f32
    %cst_3 = arith.constant 0.000000e+00 : f32
    %5 = vector.broadcast %cst : f32 to vector<16x64xf32>
    %6 = vector.broadcast %cst_3 : f32 to vector<16x64xf32>
    %7 = arith.select %4, %5, %6 : vector<16x64xi1>, vector<16x64xf32>
    %c0_4 = arith.constant 0 : index
    %c0_5 = arith.constant 0 : index
    %8 = vector.load %arg3[%c0_4, %c0_5] : memref<320x32xf32, #tpu.memory_space<vmem>>, vector<64x32xf32>
    %c0_6 = arith.constant 0 : index
    %c0_7 = arith.constant 0 : index
    %9 = vector.load %arg1[%c0_6, %c0_7] : memref<16x48xf32, #tpu.memory_space<vmem>>, vector<16x32xf32>
    %cst_8 = arith.constant dense<0.000000e+00> : vector<16x32xf32>
    %10 = tpu.matmul %7, %8, %cst_8 {dimension_numbers = #tpu.dot_dimension_numbers<[1], [0], [0], [1], [0, 0, 1, 1], [], []>} : vector<16x64xf32>, vector<64x32xf32>, vector<16x32xf32> -> vector<16x32xf32>
    %cst_9 = arith.constant 5.65685415 : f32
    %11 = vector.broadcast %cst_9 : f32 to vector<16x32xf32>
    %12 = arith.mulf %10, %11 : vector<16x32xf32>
    %13 = arith.addf %12, %9 : vector<16x32xf32>
    %c0_10 = arith.constant 0 : index
    %c32 = arith.constant 32 : index
    %14 = vector.load %arg1[%c0_10, %c32] : memref<16x48xf32, #tpu.memory_space<vmem>>, vector<16x16xf32>
    %15 = vector.extract_strided_slice %0 {offsets = [0, 0], sizes = [1, 32], strides = [1, 1]} : vector<24x128xf32> to vector<1x32xf32>
    %16 = vector.extract_strided_slice %0 {offsets = [1, 0], sizes = [1, 32], strides = [1, 1]} : vector<24x128xf32> to vector<1x32xf32>
    %17 = vector.extract_strided_slice %0 {offsets = [2, 0], sizes = [1, 64], strides = [1, 1]} : vector<24x128xf32> to vector<1x64xf32>
    %18 = vector.extract_strided_slice %0 {offsets = [3, 0], sizes = [1, 128], strides = [1, 1]} : vector<24x128xf32> to vector<1x128xf32>
    %19 = vector.extract_strided_slice %0 {offsets = [4, 0], sizes = [1, 32], strides = [1, 1]} : vector<24x128xf32> to vector<1x32xf32>
    %20 = vector.extract_strided_slice %0 {offsets = [5, 0], sizes = [1, 32], strides = [1, 1]} : vector<24x128xf32> to vector<1x32xf32>
    %21 = vector.extract_strided_slice %0 {offsets = [6, 0], sizes = [1, 32], strides = [1, 1]} : vector<24x128xf32> to vector<1x32xf32>
    %22 = vector.extract_strided_slice %0 {offsets = [7, 0], sizes = [1, 128], strides = [1, 1]} : vector<24x128xf32> to vector<1x128xf32>
    %23 = vector.extract_strided_slice %0 {offsets = [8, 0], sizes = [1, 32], strides = [1, 1]} : vector<24x128xf32> to vector<1x32xf32>
    %c0_11 = arith.constant 0 : index
    %c640 = arith.constant 640 : index
    %24 = vector.load %arg2[%c0_11, %c640] : memref<32x768xf32, #tpu.memory_space<vmem>>, vector<32x64xf32>
    %c0_12 = arith.constant 0 : index
    %c0_13 = arith.constant 0 : index
    %25 = vector.load %arg2[%c0_12, %c0_13] : memref<32x768xf32, #tpu.memory_space<vmem>>, vector<32x128xf32>
    %c0_14 = arith.constant 0 : index
    %c256 = arith.constant 256 : index
    %26 = vector.load %arg2[%c0_14, %c256] : memref<32x768xf32, #tpu.memory_space<vmem>>, vector<32x128xf32>
    %c64 = arith.constant 64 : index
    %c0_15 = arith.constant 0 : index
    %27 = vector.load %arg3[%c64, %c0_15] : memref<320x32xf32, #tpu.memory_space<vmem>>, vector<128x32xf32>
    %cst_16 = arith.constant dense<0.000000e+00> : vector<16xf32>
    %28 = vector.multi_reduction <add>, %13, %cst_16 [1] : vector<16x32xf32> to vector<16xf32>
    %29 = vector.shape_cast %28 : vector<16xf32> to vector<16x1xf32>
    %cst_17 = arith.constant 3.200000e+01 : f32
    %30 = vector.broadcast %cst_17 : f32 to vector<16x1xf32>
    %31 = arith.divf %29, %30 : vector<16x1xf32>
    %32 = vector.broadcast %31 : vector<16x1xf32> to vector<16x32xf32>
    %33 = arith.subf %13, %32 : vector<16x32xf32>
    %34 = arith.mulf %33, %33 : vector<16x32xf32>
    %cst_18 = arith.constant dense<0.000000e+00> : vector<16xf32>
    %35 = vector.multi_reduction <add>, %34, %cst_18 [1] : vector<16x32xf32> to vector<16xf32>
    %36 = vector.shape_cast %35 : vector<16xf32> to vector<16x1xf32>
    %cst_19 = arith.constant 3.100000e+01 : f32
    %37 = vector.broadcast %cst_19 : f32 to vector<16x1xf32>
    %38 = arith.divf %36, %37 : vector<16x1xf32>
    %39 = math.sqrt %38 : vector<16x1xf32>
    %40 = vector.broadcast %15 : vector<1x32xf32> to vector<16x32xf32>
    %41 = arith.mulf %40, %33 : vector<16x32xf32>
    %cst_20 = arith.constant 9.99999997E-7 : f32
    %42 = vector.broadcast %cst_20 : f32 to vector<16x1xf32>
    %43 = arith.addf %39, %42 : vector<16x1xf32>
    %44 = vector.broadcast %43 : vector<16x1xf32> to vector<16x32xf32>
    %45 = arith.divf %41, %44 : vector<16x32xf32>
    %46 = vector.broadcast %16 : vector<1x32xf32> to vector<16x32xf32>
    %47 = arith.addf %45, %46 : vector<16x32xf32>
    %cst_21 = arith.constant dense<0.000000e+00> : vector<16x64xf32>
    %48 = tpu.matmul %47, %24, %cst_21 {dimension_numbers = #tpu.dot_dimension_numbers<[1], [0], [0], [1], [0, 0, 1, 1], [], []>} : vector<16x32xf32>, vector<32x64xf32>, vector<16x64xf32> -> vector<16x64xf32>
    %49 = vector.broadcast %17 : vector<1x64xf32> to vector<16x64xf32>
    %50 = arith.addf %48, %49 : vector<16x64xf32>
    %cst_22 = arith.constant dense<0.000000e+00> : vector<16x128xf32>
    %51 = tpu.matmul %47, %25, %cst_22 {dimension_numbers = #tpu.dot_dimension_numbers<[1], [0], [0], [1], [0, 0, 1, 1], [], []>} : vector<16x32xf32>, vector<32x128xf32>, vector<16x128xf32> -> vector<16x128xf32>
    %52 = vector.broadcast %18 : vector<1x128xf32> to vector<16x128xf32>
    %53 = arith.addf %51, %52 : vector<16x128xf32>
    %54 = vector.extract_strided_slice %50 {offsets = [0, 0], sizes = [16, 32], strides = [1, 1]} : vector<16x64xf32> to vector<16x32xf32>
    %55 = vector.extract_strided_slice %50 {offsets = [0, 32], sizes = [16, 32], strides = [1, 1]} : vector<16x64xf32> to vector<16x32xf32>
    %cst_23 = arith.constant 0.000000e+00 : f32
    %56 = vector.broadcast %cst_23 : f32 to vector<16x32xf32>
    %57 = vector.extract_strided_slice %54 {offsets = [0, 0], sizes = [16, 8], strides = [1, 1]} : vector<16x32xf32> to vector<16x8xf32>
    %58 = vector.extract_strided_slice %55 {offsets = [0, 0], sizes = [16, 8], strides = [1, 1]} : vector<16x32xf32> to vector<16x8xf32>
    %59 = vector.extract_strided_slice %53 {offsets = [0, 0], sizes = [16, 32], strides = [1, 1]} : vector<16x128xf32> to vector<16x32xf32>
    %60 = tpu.transpose %58, [1, 0] : vector<16x8xf32> -> vector<8x16xf32>
    %cst_24 = arith.constant dense<0.000000e+00> : vector<16x16xf32>
    %61 = tpu.matmul %57, %60, %cst_24 {dimension_numbers = #tpu.dot_dimension_numbers<[1], [0], [0], [1], [0, 0, 1, 1], [], []>} : vector<16x8xf32>, vector<8x16xf32>, vector<16x16xf32> -> vector<16x16xf32>
    %62 = arith.addf %61, %14 : vector<16x16xf32>
    %cst_25 = arith.constant dense<0xFF800000> : vector<16xf32>
    %63 = vector.multi_reduction <maximumf>, %62, %cst_25 [1] : vector<16x16xf32> to vector<16xf32>
    %64 = vector.shape_cast %63 : vector<16xf32> to vector<16x1xf32>
    %65 = vector.broadcast %64 : vector<16x1xf32> to vector<16x16xf32>
    %66 = arith.subf %62, %65 : vector<16x16xf32>
    %67 = math.exp %66 : vector<16x16xf32>
    %cst_26 = arith.constant dense<0.000000e+00> : vector<16xf32>
    %68 = vector.multi_reduction <add>, %67, %cst_26 [1] : vector<16x16xf32> to vector<16xf32>
    %69 = vector.shape_cast %68 : vector<16xf32> to vector<16x1xf32>
    %70 = tpu.reciprocal %69 {approx = true} : vector<16x1xf32> -> vector<16x1xf32>
    %71 = vector.broadcast %70 : vector<16x1xf32> to vector<16x16xf32>
    %72 = arith.mulf %67, %71 : vector<16x16xf32>
    %cst_27 = arith.constant dense<0.000000e+00> : vector<16x32xf32>
    %73 = tpu.matmul %72, %59, %cst_27 {dimension_numbers = #tpu.dot_dimension_numbers<[1], [0], [0], [1], [0, 0, 1, 1], [], []>} : vector<16x16xf32>, vector<16x32xf32>, vector<16x32xf32> -> vector<16x32xf32>
    %74 = arith.addf %56, %73 : vector<16x32xf32>
    %75 = vector.extract_strided_slice %54 {offsets = [0, 8], sizes = [16, 8], strides = [1, 1]} : vector<16x32xf32> to vector<16x8xf32>
    %76 = vector.extract_strided_slice %55 {offsets = [0, 8], sizes = [16, 8], strides = [1, 1]} : vector<16x32xf32> to vector<16x8xf32>
    %77 = vector.extract_strided_slice %53 {offsets = [0, 32], sizes = [16, 32], strides = [1, 1]} : vector<16x128xf32> to vector<16x32xf32>
    %78 = tpu.transpose %76, [1, 0] : vector<16x8xf32> -> vector<8x16xf32>
    %cst_28 = arith.constant dense<0.000000e+00> : vector<16x16xf32>
    %79 = tpu.matmul %75, %78, %cst_28 {dimension_numbers = #tpu.dot_dimension_numbers<[1], [0], [0], [1], [0, 0, 1, 1], [], []>} : vector<16x8xf32>, vector<8x16xf32>, vector<16x16xf32> -> vector<16x16xf32>
    %80 = arith.addf %79, %14 : vector<16x16xf32>
    %cst_29 = arith.constant dense<0xFF800000> : vector<16xf32>
    %81 = vector.multi_reduction <maximumf>, %80, %cst_29 [1] : vector<16x16xf32> to vector<16xf32>
    %82 = vector.shape_cast %81 : vector<16xf32> to vector<16x1xf32>
    %83 = vector.broadcast %82 : vector<16x1xf32> to vector<16x16xf32>
    %84 = arith.subf %80, %83 : vector<16x16xf32>
    %85 = math.exp %84 : vector<16x16xf32>
    %cst_30 = arith.constant dense<0.000000e+00> : vector<16xf32>
    %86 = vector.multi_reduction <add>, %85, %cst_30 [1] : vector<16x16xf32> to vector<16xf32>
    %87 = vector.shape_cast %86 : vector<16xf32> to vector<16x1xf32>
    %88 = tpu.reciprocal %87 {approx = true} : vector<16x1xf32> -> vector<16x1xf32>
    %89 = vector.broadcast %88 : vector<16x1xf32> to vector<16x16xf32>
    %90 = arith.mulf %85, %89 : vector<16x16xf32>
    %cst_31 = arith.constant dense<0.000000e+00> : vector<16x32xf32>
    %91 = tpu.matmul %90, %77, %cst_31 {dimension_numbers = #tpu.dot_dimension_numbers<[1], [0], [0], [1], [0, 0, 1, 1], [], []>} : vector<16x16xf32>, vector<16x32xf32>, vector<16x32xf32> -> vector<16x32xf32>
    %92 = arith.addf %74, %91 : vector<16x32xf32>
    %93 = vector.extract_strided_slice %54 {offsets = [0, 16], sizes = [16, 8], strides = [1, 1]} : vector<16x32xf32> to vector<16x8xf32>
    %94 = vector.extract_strided_slice %55 {offsets = [0, 16], sizes = [16, 8], strides = [1, 1]} : vector<16x32xf32> to vector<16x8xf32>
    %95 = vector.extract_strided_slice %53 {offsets = [0, 64], sizes = [16, 32], strides = [1, 1]} : vector<16x128xf32> to vector<16x32xf32>
    %96 = tpu.transpose %94, [1, 0] : vector<16x8xf32> -> vector<8x16xf32>
    %cst_32 = arith.constant dense<0.000000e+00> : vector<16x16xf32>
    %97 = tpu.matmul %93, %96, %cst_32 {dimension_numbers = #tpu.dot_dimension_numbers<[1], [0], [0], [1], [0, 0, 1, 1], [], []>} : vector<16x8xf32>, vector<8x16xf32>, vector<16x16xf32> -> vector<16x16xf32>
    %98 = arith.addf %97, %14 : vector<16x16xf32>
    %cst_33 = arith.constant dense<0xFF800000> : vector<16xf32>
    %99 = vector.multi_reduction <maximumf>, %98, %cst_33 [1] : vector<16x16xf32> to vector<16xf32>
    %100 = vector.shape_cast %99 : vector<16xf32> to vector<16x1xf32>
    %101 = vector.broadcast %100 : vector<16x1xf32> to vector<16x16xf32>
    %102 = arith.subf %98, %101 : vector<16x16xf32>
    %103 = math.exp %102 : vector<16x16xf32>
    %cst_34 = arith.constant dense<0.000000e+00> : vector<16xf32>
    %104 = vector.multi_reduction <add>, %103, %cst_34 [1] : vector<16x16xf32> to vector<16xf32>
    %105 = vector.shape_cast %104 : vector<16xf32> to vector<16x1xf32>
    %106 = tpu.reciprocal %105 {approx = true} : vector<16x1xf32> -> vector<16x1xf32>
    %107 = vector.broadcast %106 : vector<16x1xf32> to vector<16x16xf32>
    %108 = arith.mulf %103, %107 : vector<16x16xf32>
    %cst_35 = arith.constant dense<0.000000e+00> : vector<16x32xf32>
    %109 = tpu.matmul %108, %95, %cst_35 {dimension_numbers = #tpu.dot_dimension_numbers<[1], [0], [0], [1], [0, 0, 1, 1], [], []>} : vector<16x16xf32>, vector<16x32xf32>, vector<16x32xf32> -> vector<16x32xf32>
    %110 = arith.addf %92, %109 : vector<16x32xf32>
    %111 = vector.extract_strided_slice %54 {offsets = [0, 24], sizes = [16, 8], strides = [1, 1]} : vector<16x32xf32> to vector<16x8xf32>
    %112 = vector.extract_strided_slice %55 {offsets = [0, 24], sizes = [16, 8], strides = [1, 1]} : vector<16x32xf32> to vector<16x8xf32>
    %113 = vector.extract_strided_slice %53 {offsets = [0, 96], sizes = [16, 32], strides = [1, 1]} : vector<16x128xf32> to vector<16x32xf32>
    %114 = tpu.transpose %112, [1, 0] : vector<16x8xf32> -> vector<8x16xf32>
    %cst_36 = arith.constant dense<0.000000e+00> : vector<16x16xf32>
    %115 = tpu.matmul %111, %114, %cst_36 {dimension_numbers = #tpu.dot_dimension_numbers<[1], [0], [0], [1], [0, 0, 1, 1], [], []>} : vector<16x8xf32>, vector<8x16xf32>, vector<16x16xf32> -> vector<16x16xf32>
    %116 = arith.addf %115, %14 : vector<16x16xf32>
    %cst_37 = arith.constant dense<0xFF800000> : vector<16xf32>
    %117 = vector.multi_reduction <maximumf>, %116, %cst_37 [1] : vector<16x16xf32> to vector<16xf32>
    %118 = vector.shape_cast %117 : vector<16xf32> to vector<16x1xf32>
    %119 = vector.broadcast %118 : vector<16x1xf32> to vector<16x16xf32>
    %120 = arith.subf %116, %119 : vector<16x16xf32>
    %121 = math.exp %120 : vector<16x16xf32>
    %cst_38 = arith.constant dense<0.000000e+00> : vector<16xf32>
    %122 = vector.multi_reduction <add>, %121, %cst_38 [1] : vector<16x16xf32> to vector<16xf32>
    %123 = vector.shape_cast %122 : vector<16xf32> to vector<16x1xf32>
    %124 = tpu.reciprocal %123 {approx = true} : vector<16x1xf32> -> vector<16x1xf32>
    %125 = vector.broadcast %124 : vector<16x1xf32> to vector<16x16xf32>
    %126 = arith.mulf %121, %125 : vector<16x16xf32>
    %cst_39 = arith.constant dense<0.000000e+00> : vector<16x32xf32>
    %127 = tpu.matmul %126, %113, %cst_39 {dimension_numbers = #tpu.dot_dimension_numbers<[1], [0], [0], [1], [0, 0, 1, 1], [], []>} : vector<16x16xf32>, vector<16x32xf32>, vector<16x32xf32> -> vector<16x32xf32>
    %128 = arith.addf %110, %127 : vector<16x32xf32>
    %129 = arith.addf %13, %128 : vector<16x32xf32>
    %130 = vector.broadcast %19 : vector<1x32xf32> to vector<16x32xf32>
    %131 = arith.addf %129, %130 : vector<16x32xf32>
    %cst_40 = arith.constant dense<0.000000e+00> : vector<16xf32>
    %132 = vector.multi_reduction <add>, %131, %cst_40 [1] : vector<16x32xf32> to vector<16xf32>
    %133 = vector.shape_cast %132 : vector<16xf32> to vector<16x1xf32>
    %cst_41 = arith.constant 3.200000e+01 : f32
    %134 = vector.broadcast %cst_41 : f32 to vector<16x1xf32>
    %135 = arith.divf %133, %134 : vector<16x1xf32>
    %136 = vector.broadcast %135 : vector<16x1xf32> to vector<16x32xf32>
    %137 = arith.subf %131, %136 : vector<16x32xf32>
    %138 = arith.mulf %137, %137 : vector<16x32xf32>
    %cst_42 = arith.constant dense<0.000000e+00> : vector<16xf32>
    %139 = vector.multi_reduction <add>, %138, %cst_42 [1] : vector<16x32xf32> to vector<16xf32>
    %140 = vector.shape_cast %139 : vector<16xf32> to vector<16x1xf32>
    %cst_43 = arith.constant 3.100000e+01 : f32
    %141 = vector.broadcast %cst_43 : f32 to vector<16x1xf32>
    %142 = arith.divf %140, %141 : vector<16x1xf32>
    %143 = math.sqrt %142 : vector<16x1xf32>
    %144 = vector.broadcast %20 : vector<1x32xf32> to vector<16x32xf32>
    %145 = arith.mulf %144, %137 : vector<16x32xf32>
    %cst_44 = arith.constant 9.99999997E-7 : f32
    %146 = vector.broadcast %cst_44 : f32 to vector<16x1xf32>
    %147 = arith.addf %143, %146 : vector<16x1xf32>
    %148 = vector.broadcast %147 : vector<16x1xf32> to vector<16x32xf32>
    %149 = arith.divf %145, %148 : vector<16x32xf32>
    %150 = vector.broadcast %21 : vector<1x32xf32> to vector<16x32xf32>
    %151 = arith.addf %149, %150 : vector<16x32xf32>
    %cst_45 = arith.constant dense<0.000000e+00> : vector<16x128xf32>
    %152 = tpu.matmul %151, %26, %cst_45 {dimension_numbers = #tpu.dot_dimension_numbers<[1], [0], [0], [1], [0, 0, 1, 1], [], []>} : vector<16x32xf32>, vector<32x128xf32>, vector<16x128xf32> -> vector<16x128xf32>
    %153 = vector.broadcast %22 : vector<1x128xf32> to vector<16x128xf32>
    %154 = arith.addf %152, %153 : vector<16x128xf32>
    %cst_46 = arith.constant 0.000000e+00 : f32
    %155 = vector.broadcast %cst_46 : f32 to vector<16x128xf32>
    %156 = arith.maximumf %154, %155 : vector<16x128xf32>
    %cst_47 = arith.constant dense<0.000000e+00> : vector<16x32xf32>
    %157 = tpu.matmul %156, %27, %cst_47 {dimension_numbers = #tpu.dot_dimension_numbers<[1], [0], [0], [1], [0, 0, 1, 1], [], []>} : vector<16x128xf32>, vector<128x32xf32>, vector<16x32xf32> -> vector<16x32xf32>
    %158 = arith.addf %131, %157 : vector<16x32xf32>
    %159 = vector.broadcast %23 : vector<1x32xf32> to vector<16x32xf32>
    %160 = arith.addf %158, %159 : vector<16x32xf32>
    %161 = vector.extract_strided_slice %0 {offsets = [9, 0], sizes = [1, 32], strides = [1, 1]} : vector<24x128xf32> to vector<1x32xf32>
    %162 = vector.extract_strided_slice %0 {offsets = [10, 0], sizes = [1, 32], strides = [1, 1]} : vector<24x128xf32> to vector<1x32xf32>
    %163 = vector.extract_strided_slice %0 {offsets = [11, 0], sizes = [1, 64], strides = [1, 1]} : vector<24x128xf32> to vector<1x64xf32>
    %164 = vector.extract_strided_slice %0 {offsets = [12, 0], sizes = [1, 128], strides = [1, 1]} : vector<24x128xf32> to vector<1x128xf32>
    %165 = vector.extract_strided_slice %0 {offsets = [13, 0], sizes = [1, 32], strides = [1, 1]} : vector<24x128xf32> to vector<1x32xf32>
    %166 = vector.extract_strided_slice %0 {offsets = [14, 0], sizes = [1, 32], strides = [1, 1]} : vector<24x128xf32> to vector<1x32xf32>
    %167 = vector.extract_strided_slice %0 {offsets = [15, 0], sizes = [1, 32], strides = [1, 1]} : vector<24x128xf32> to vector<1x32xf32>
    %168 = vector.extract_strided_slice %0 {offsets = [16, 0], sizes = [1, 128], strides = [1, 1]} : vector<24x128xf32> to vector<1x128xf32>
    %169 = vector.extract_strided_slice %0 {offsets = [17, 0], sizes = [1, 32], strides = [1, 1]} : vector<24x128xf32> to vector<1x32xf32>
    %c0_48 = arith.constant 0 : index
    %c704 = arith.constant 704 : index
    %170 = vector.load %arg2[%c0_48, %c704] : memref<32x768xf32, #tpu.memory_space<vmem>>, vector<32x64xf32>
    %c0_49 = arith.constant 0 : index
    %c128 = arith.constant 128 : index
    %171 = vector.load %arg2[%c0_49, %c128] : memref<32x768xf32, #tpu.memory_space<vmem>>, vector<32x128xf32>
    %c0_50 = arith.constant 0 : index
    %c384 = arith.constant 384 : index
    %172 = vector.load %arg2[%c0_50, %c384] : memref<32x768xf32, #tpu.memory_space<vmem>>, vector<32x128xf32>
    %c192 = arith.constant 192 : index
    %c0_51 = arith.constant 0 : index
    %173 = vector.load %arg3[%c192, %c0_51] : memref<320x32xf32, #tpu.memory_space<vmem>>, vector<128x32xf32>
    %cst_52 = arith.constant dense<0.000000e+00> : vector<16xf32>
    %174 = vector.multi_reduction <add>, %160, %cst_52 [1] : vector<16x32xf32> to vector<16xf32>
    %175 = vector.shape_cast %174 : vector<16xf32> to vector<16x1xf32>
    %cst_53 = arith.constant 3.200000e+01 : f32
    %176 = vector.broadcast %cst_53 : f32 to vector<16x1xf32>
    %177 = arith.divf %175, %176 : vector<16x1xf32>
    %178 = vector.broadcast %177 : vector<16x1xf32> to vector<16x32xf32>
    %179 = arith.subf %160, %178 : vector<16x32xf32>
    %180 = arith.mulf %179, %179 : vector<16x32xf32>
    %cst_54 = arith.constant dense<0.000000e+00> : vector<16xf32>
    %181 = vector.multi_reduction <add>, %180, %cst_54 [1] : vector<16x32xf32> to vector<16xf32>
    %182 = vector.shape_cast %181 : vector<16xf32> to vector<16x1xf32>
    %cst_55 = arith.constant 3.100000e+01 : f32
    %183 = vector.broadcast %cst_55 : f32 to vector<16x1xf32>
    %184 = arith.divf %182, %183 : vector<16x1xf32>
    %185 = math.sqrt %184 : vector<16x1xf32>
    %186 = vector.broadcast %161 : vector<1x32xf32> to vector<16x32xf32>
    %187 = arith.mulf %186, %179 : vector<16x32xf32>
    %cst_56 = arith.constant 9.99999997E-7 : f32
    %188 = vector.broadcast %cst_56 : f32 to vector<16x1xf32>
    %189 = arith.addf %185, %188 : vector<16x1xf32>
    %190 = vector.broadcast %189 : vector<16x1xf32> to vector<16x32xf32>
    %191 = arith.divf %187, %190 : vector<16x32xf32>
    %192 = vector.broadcast %162 : vector<1x32xf32> to vector<16x32xf32>
    %193 = arith.addf %191, %192 : vector<16x32xf32>
    %cst_57 = arith.constant dense<0.000000e+00> : vector<16x64xf32>
    %194 = tpu.matmul %193, %170, %cst_57 {dimension_numbers = #tpu.dot_dimension_numbers<[1], [0], [0], [1], [0, 0, 1, 1], [], []>} : vector<16x32xf32>, vector<32x64xf32>, vector<16x64xf32> -> vector<16x64xf32>
    %195 = vector.broadcast %163 : vector<1x64xf32> to vector<16x64xf32>
    %196 = arith.addf %194, %195 : vector<16x64xf32>
    %cst_58 = arith.constant dense<0.000000e+00> : vector<16x128xf32>
    %197 = tpu.matmul %193, %171, %cst_58 {dimension_numbers = #tpu.dot_dimension_numbers<[1], [0], [0], [1], [0, 0, 1, 1], [], []>} : vector<16x32xf32>, vector<32x128xf32>, vector<16x128xf32> -> vector<16x128xf32>
    %198 = vector.broadcast %164 : vector<1x128xf32> to vector<16x128xf32>
    %199 = arith.addf %197, %198 : vector<16x128xf32>
    %200 = vector.extract_strided_slice %196 {offsets = [0, 0], sizes = [16, 32], strides = [1, 1]} : vector<16x64xf32> to vector<16x32xf32>
    %201 = vector.extract_strided_slice %196 {offsets = [0, 32], sizes = [16, 32], strides = [1, 1]} : vector<16x64xf32> to vector<16x32xf32>
    %cst_59 = arith.constant 0.000000e+00 : f32
    %202 = vector.broadcast %cst_59 : f32 to vector<16x32xf32>
    %203 = vector.extract_strided_slice %200 {offsets = [0, 0], sizes = [16, 8], strides = [1, 1]} : vector<16x32xf32> to vector<16x8xf32>
    %204 = vector.extract_strided_slice %201 {offsets = [0, 0], sizes = [16, 8], strides = [1, 1]} : vector<16x32xf32> to vector<16x8xf32>
    %205 = vector.extract_strided_slice %199 {offsets = [0, 0], sizes = [16, 32], strides = [1, 1]} : vector<16x128xf32> to vector<16x32xf32>
    %206 = tpu.transpose %204, [1, 0] : vector<16x8xf32> -> vector<8x16xf32>
    %cst_60 = arith.constant dense<0.000000e+00> : vector<16x16xf32>
    %207 = tpu.matmul %203, %206, %cst_60 {dimension_numbers = #tpu.dot_dimension_numbers<[1], [0], [0], [1], [0, 0, 1, 1], [], []>} : vector<16x8xf32>, vector<8x16xf32>, vector<16x16xf32> -> vector<16x16xf32>
    %208 = arith.addf %207, %14 : vector<16x16xf32>
    %cst_61 = arith.constant dense<0xFF800000> : vector<16xf32>
    %209 = vector.multi_reduction <maximumf>, %208, %cst_61 [1] : vector<16x16xf32> to vector<16xf32>
    %210 = vector.shape_cast %209 : vector<16xf32> to vector<16x1xf32>
    %211 = vector.broadcast %210 : vector<16x1xf32> to vector<16x16xf32>
    %212 = arith.subf %208, %211 : vector<16x16xf32>
    %213 = math.exp %212 : vector<16x16xf32>
    %cst_62 = arith.constant dense<0.000000e+00> : vector<16xf32>
    %214 = vector.multi_reduction <add>, %213, %cst_62 [1] : vector<16x16xf32> to vector<16xf32>
    %215 = vector.shape_cast %214 : vector<16xf32> to vector<16x1xf32>
    %216 = tpu.reciprocal %215 {approx = true} : vector<16x1xf32> -> vector<16x1xf32>
    %217 = vector.broadcast %216 : vector<16x1xf32> to vector<16x16xf32>
    %218 = arith.mulf %213, %217 : vector<16x16xf32>
    %cst_63 = arith.constant dense<0.000000e+00> : vector<16x32xf32>
    %219 = tpu.matmul %218, %205, %cst_63 {dimension_numbers = #tpu.dot_dimension_numbers<[1], [0], [0], [1], [0, 0, 1, 1], [], []>} : vector<16x16xf32>, vector<16x32xf32>, vector<16x32xf32> -> vector<16x32xf32>
    %220 = arith.addf %202, %219 : vector<16x32xf32>
    %221 = vector.extract_strided_slice %200 {offsets = [0, 8], sizes = [16, 8], strides = [1, 1]} : vector<16x32xf32> to vector<16x8xf32>
    %222 = vector.extract_strided_slice %201 {offsets = [0, 8], sizes = [16, 8], strides = [1, 1]} : vector<16x32xf32> to vector<16x8xf32>
    %223 = vector.extract_strided_slice %199 {offsets = [0, 32], sizes = [16, 32], strides = [1, 1]} : vector<16x128xf32> to vector<16x32xf32>
    %224 = tpu.transpose %222, [1, 0] : vector<16x8xf32> -> vector<8x16xf32>
    %cst_64 = arith.constant dense<0.000000e+00> : vector<16x16xf32>
    %225 = tpu.matmul %221, %224, %cst_64 {dimension_numbers = #tpu.dot_dimension_numbers<[1], [0], [0], [1], [0, 0, 1, 1], [], []>} : vector<16x8xf32>, vector<8x16xf32>, vector<16x16xf32> -> vector<16x16xf32>
    %226 = arith.addf %225, %14 : vector<16x16xf32>
    %cst_65 = arith.constant dense<0xFF800000> : vector<16xf32>
    %227 = vector.multi_reduction <maximumf>, %226, %cst_65 [1] : vector<16x16xf32> to vector<16xf32>
    %228 = vector.shape_cast %227 : vector<16xf32> to vector<16x1xf32>
    %229 = vector.broadcast %228 : vector<16x1xf32> to vector<16x16xf32>
    %230 = arith.subf %226, %229 : vector<16x16xf32>
    %231 = math.exp %230 : vector<16x16xf32>
    %cst_66 = arith.constant dense<0.000000e+00> : vector<16xf32>
    %232 = vector.multi_reduction <add>, %231, %cst_66 [1] : vector<16x16xf32> to vector<16xf32>
    %233 = vector.shape_cast %232 : vector<16xf32> to vector<16x1xf32>
    %234 = tpu.reciprocal %233 {approx = true} : vector<16x1xf32> -> vector<16x1xf32>
    %235 = vector.broadcast %234 : vector<16x1xf32> to vector<16x16xf32>
    %236 = arith.mulf %231, %235 : vector<16x16xf32>
    %cst_67 = arith.constant dense<0.000000e+00> : vector<16x32xf32>
    %237 = tpu.matmul %236, %223, %cst_67 {dimension_numbers = #tpu.dot_dimension_numbers<[1], [0], [0], [1], [0, 0, 1, 1], [], []>} : vector<16x16xf32>, vector<16x32xf32>, vector<16x32xf32> -> vector<16x32xf32>
    %238 = arith.addf %220, %237 : vector<16x32xf32>
    %239 = vector.extract_strided_slice %200 {offsets = [0, 16], sizes = [16, 8], strides = [1, 1]} : vector<16x32xf32> to vector<16x8xf32>
    %240 = vector.extract_strided_slice %201 {offsets = [0, 16], sizes = [16, 8], strides = [1, 1]} : vector<16x32xf32> to vector<16x8xf32>
    %241 = vector.extract_strided_slice %199 {offsets = [0, 64], sizes = [16, 32], strides = [1, 1]} : vector<16x128xf32> to vector<16x32xf32>
    %242 = tpu.transpose %240, [1, 0] : vector<16x8xf32> -> vector<8x16xf32>
    %cst_68 = arith.constant dense<0.000000e+00> : vector<16x16xf32>
    %243 = tpu.matmul %239, %242, %cst_68 {dimension_numbers = #tpu.dot_dimension_numbers<[1], [0], [0], [1], [0, 0, 1, 1], [], []>} : vector<16x8xf32>, vector<8x16xf32>, vector<16x16xf32> -> vector<16x16xf32>
    %244 = arith.addf %243, %14 : vector<16x16xf32>
    %cst_69 = arith.constant dense<0xFF800000> : vector<16xf32>
    %245 = vector.multi_reduction <maximumf>, %244, %cst_69 [1] : vector<16x16xf32> to vector<16xf32>
    %246 = vector.shape_cast %245 : vector<16xf32> to vector<16x1xf32>
    %247 = vector.broadcast %246 : vector<16x1xf32> to vector<16x16xf32>
    %248 = arith.subf %244, %247 : vector<16x16xf32>
    %249 = math.exp %248 : vector<16x16xf32>
    %cst_70 = arith.constant dense<0.000000e+00> : vector<16xf32>
    %250 = vector.multi_reduction <add>, %249, %cst_70 [1] : vector<16x16xf32> to vector<16xf32>
    %251 = vector.shape_cast %250 : vector<16xf32> to vector<16x1xf32>
    %252 = tpu.reciprocal %251 {approx = true} : vector<16x1xf32> -> vector<16x1xf32>
    %253 = vector.broadcast %252 : vector<16x1xf32> to vector<16x16xf32>
    %254 = arith.mulf %249, %253 : vector<16x16xf32>
    %cst_71 = arith.constant dense<0.000000e+00> : vector<16x32xf32>
    %255 = tpu.matmul %254, %241, %cst_71 {dimension_numbers = #tpu.dot_dimension_numbers<[1], [0], [0], [1], [0, 0, 1, 1], [], []>} : vector<16x16xf32>, vector<16x32xf32>, vector<16x32xf32> -> vector<16x32xf32>
    %256 = arith.addf %238, %255 : vector<16x32xf32>
    %257 = vector.extract_strided_slice %200 {offsets = [0, 24], sizes = [16, 8], strides = [1, 1]} : vector<16x32xf32> to vector<16x8xf32>
    %258 = vector.extract_strided_slice %201 {offsets = [0, 24], sizes = [16, 8], strides = [1, 1]} : vector<16x32xf32> to vector<16x8xf32>
    %259 = vector.extract_strided_slice %199 {offsets = [0, 96], sizes = [16, 32], strides = [1, 1]} : vector<16x128xf32> to vector<16x32xf32>
    %260 = tpu.transpose %258, [1, 0] : vector<16x8xf32> -> vector<8x16xf32>
    %cst_72 = arith.constant dense<0.000000e+00> : vector<16x16xf32>
    %261 = tpu.matmul %257, %260, %cst_72 {dimension_numbers = #tpu.dot_dimension_numbers<[1], [0], [0], [1], [0, 0, 1, 1], [], []>} : vector<16x8xf32>, vector<8x16xf32>, vector<16x16xf32> -> vector<16x16xf32>
    %262 = arith.addf %261, %14 : vector<16x16xf32>
    %cst_73 = arith.constant dense<0xFF800000> : vector<16xf32>
    %263 = vector.multi_reduction <maximumf>, %262, %cst_73 [1] : vector<16x16xf32> to vector<16xf32>
    %264 = vector.shape_cast %263 : vector<16xf32> to vector<16x1xf32>
    %265 = vector.broadcast %264 : vector<16x1xf32> to vector<16x16xf32>
    %266 = arith.subf %262, %265 : vector<16x16xf32>
    %267 = math.exp %266 : vector<16x16xf32>
    %cst_74 = arith.constant dense<0.000000e+00> : vector<16xf32>
    %268 = vector.multi_reduction <add>, %267, %cst_74 [1] : vector<16x16xf32> to vector<16xf32>
    %269 = vector.shape_cast %268 : vector<16xf32> to vector<16x1xf32>
    %270 = tpu.reciprocal %269 {approx = true} : vector<16x1xf32> -> vector<16x1xf32>
    %271 = vector.broadcast %270 : vector<16x1xf32> to vector<16x16xf32>
    %272 = arith.mulf %267, %271 : vector<16x16xf32>
    %cst_75 = arith.constant dense<0.000000e+00> : vector<16x32xf32>
    %273 = tpu.matmul %272, %259, %cst_75 {dimension_numbers = #tpu.dot_dimension_numbers<[1], [0], [0], [1], [0, 0, 1, 1], [], []>} : vector<16x16xf32>, vector<16x32xf32>, vector<16x32xf32> -> vector<16x32xf32>
    %274 = arith.addf %256, %273 : vector<16x32xf32>
    %275 = arith.addf %160, %274 : vector<16x32xf32>
    %276 = vector.broadcast %165 : vector<1x32xf32> to vector<16x32xf32>
    %277 = arith.addf %275, %276 : vector<16x32xf32>
    %cst_76 = arith.constant dense<0.000000e+00> : vector<16xf32>
    %278 = vector.multi_reduction <add>, %277, %cst_76 [1] : vector<16x32xf32> to vector<16xf32>
    %279 = vector.shape_cast %278 : vector<16xf32> to vector<16x1xf32>
    %cst_77 = arith.constant 3.200000e+01 : f32
    %280 = vector.broadcast %cst_77 : f32 to vector<16x1xf32>
    %281 = arith.divf %279, %280 : vector<16x1xf32>
    %282 = vector.broadcast %281 : vector<16x1xf32> to vector<16x32xf32>
    %283 = arith.subf %277, %282 : vector<16x32xf32>
    %284 = arith.mulf %283, %283 : vector<16x32xf32>
    %cst_78 = arith.constant dense<0.000000e+00> : vector<16xf32>
    %285 = vector.multi_reduction <add>, %284, %cst_78 [1] : vector<16x32xf32> to vector<16xf32>
    %286 = vector.shape_cast %285 : vector<16xf32> to vector<16x1xf32>
    %cst_79 = arith.constant 3.100000e+01 : f32
    %287 = vector.broadcast %cst_79 : f32 to vector<16x1xf32>
    %288 = arith.divf %286, %287 : vector<16x1xf32>
    %289 = math.sqrt %288 : vector<16x1xf32>
    %290 = vector.broadcast %166 : vector<1x32xf32> to vector<16x32xf32>
    %291 = arith.mulf %290, %283 : vector<16x32xf32>
    %cst_80 = arith.constant 9.99999997E-7 : f32
    %292 = vector.broadcast %cst_80 : f32 to vector<16x1xf32>
    %293 = arith.addf %289, %292 : vector<16x1xf32>
    %294 = vector.broadcast %293 : vector<16x1xf32> to vector<16x32xf32>
    %295 = arith.divf %291, %294 : vector<16x32xf32>
    %296 = vector.broadcast %167 : vector<1x32xf32> to vector<16x32xf32>
    %297 = arith.addf %295, %296 : vector<16x32xf32>
    %cst_81 = arith.constant dense<0.000000e+00> : vector<16x128xf32>
    %298 = tpu.matmul %297, %172, %cst_81 {dimension_numbers = #tpu.dot_dimension_numbers<[1], [0], [0], [1], [0, 0, 1, 1], [], []>} : vector<16x32xf32>, vector<32x128xf32>, vector<16x128xf32> -> vector<16x128xf32>
    %299 = vector.broadcast %168 : vector<1x128xf32> to vector<16x128xf32>
    %300 = arith.addf %298, %299 : vector<16x128xf32>
    %cst_82 = arith.constant 0.000000e+00 : f32
    %301 = vector.broadcast %cst_82 : f32 to vector<16x128xf32>
    %302 = arith.maximumf %300, %301 : vector<16x128xf32>
    %cst_83 = arith.constant dense<0.000000e+00> : vector<16x32xf32>
    %303 = tpu.matmul %302, %173, %cst_83 {dimension_numbers = #tpu.dot_dimension_numbers<[1], [0], [0], [1], [0, 0, 1, 1], [], []>} : vector<16x128xf32>, vector<128x32xf32>, vector<16x32xf32> -> vector<16x32xf32>
    %304 = arith.addf %277, %303 : vector<16x32xf32>
    %305 = vector.broadcast %169 : vector<1x32xf32> to vector<16x32xf32>
    %306 = arith.addf %304, %305 : vector<16x32xf32>
    %307 = vector.extract_strided_slice %0 {offsets = [18, 0], sizes = [1, 32], strides = [1, 1]} : vector<24x128xf32> to vector<1x32xf32>
    %308 = vector.extract_strided_slice %0 {offsets = [19, 0], sizes = [1, 32], strides = [1, 1]} : vector<24x128xf32> to vector<1x32xf32>
    %cst_84 = arith.constant dense<0.000000e+00> : vector<16xf32>
    %309 = vector.multi_reduction <add>, %306, %cst_84 [1] : vector<16x32xf32> to vector<16xf32>
    %310 = vector.shape_cast %309 : vector<16xf32> to vector<16x1xf32>
    %cst_85 = arith.constant 3.200000e+01 : f32
    %311 = vector.broadcast %cst_85 : f32 to vector<16x1xf32>
    %312 = arith.divf %310, %311 : vector<16x1xf32>
    %313 = vector.broadcast %312 : vector<16x1xf32> to vector<16x32xf32>
    %314 = arith.subf %306, %313 : vector<16x32xf32>
    %315 = arith.mulf %314, %314 : vector<16x32xf32>
    %cst_86 = arith.constant dense<0.000000e+00> : vector<16xf32>
    %316 = vector.multi_reduction <add>, %315, %cst_86 [1] : vector<16x32xf32> to vector<16xf32>
    %317 = vector.shape_cast %316 : vector<16xf32> to vector<16x1xf32>
    %cst_87 = arith.constant 3.100000e+01 : f32
    %318 = vector.broadcast %cst_87 : f32 to vector<16x1xf32>
    %319 = arith.divf %317, %318 : vector<16x1xf32>
    %320 = math.sqrt %319 : vector<16x1xf32>
    %321 = vector.broadcast %307 : vector<1x32xf32> to vector<16x32xf32>
    %322 = arith.mulf %321, %314 : vector<16x32xf32>
    %cst_88 = arith.constant 9.99999997E-7 : f32
    %323 = vector.broadcast %cst_88 : f32 to vector<16x1xf32>
    %324 = arith.addf %320, %323 : vector<16x1xf32>
    %325 = vector.broadcast %324 : vector<16x1xf32> to vector<16x32xf32>
    %326 = arith.divf %322, %325 : vector<16x32xf32>
    %327 = vector.broadcast %308 : vector<1x32xf32> to vector<16x32xf32>
    %328 = arith.addf %326, %327 : vector<16x32xf32>
    %c0_89 = arith.constant 0 : index
    %c512 = arith.constant 512 : index
    %329 = vector.load %arg2[%c0_89, %c512] : memref<32x768xf32, #tpu.memory_space<vmem>>, vector<32x128xf32>
    %330 = vector.extract_strided_slice %0 {offsets = [20, 0], sizes = [1, 128], strides = [1, 1]} : vector<24x128xf32> to vector<1x128xf32>
    %cst_90 = arith.constant dense<0.000000e+00> : vector<16x128xf32>
    %331 = tpu.matmul %328, %329, %cst_90 {dimension_numbers = #tpu.dot_dimension_numbers<[1], [0], [0], [1], [0, 0, 1, 1], [], []>} : vector<16x32xf32>, vector<32x128xf32>, vector<16x128xf32> -> vector<16x128xf32>
    %332 = vector.broadcast %330 : vector<1x128xf32> to vector<16x128xf32>
    %333 = arith.addf %331, %332 : vector<16x128xf32>
    %cst_91 = arith.constant dense<0xFF800000> : vector<16xf32>
    %334 = vector.multi_reduction <maximumf>, %333, %cst_91 [1] : vector<16x128xf32> to vector<16xf32>
    %335 = vector.shape_cast %334 : vector<16xf32> to vector<16x1xf32>
    %336 = vector.broadcast %335 : vector<16x1xf32> to vector<16x128xf32>
    %337 = arith.subf %333, %336 : vector<16x128xf32>
    %338 = math.exp %337 : vector<16x128xf32>
    %cst_92 = arith.constant dense<0.000000e+00> : vector<16xf32>
    %339 = vector.multi_reduction <add>, %338, %cst_92 [1] : vector<16x128xf32> to vector<16xf32>
    %340 = vector.shape_cast %339 : vector<16xf32> to vector<16x1xf32>
    %341 = math.log %340 : vector<16x1xf32>
    %342 = vector.broadcast %341 : vector<16x1xf32> to vector<16x128xf32>
    %343 = arith.subf %337, %342 : vector<16x128xf32>
    %c0_93 = arith.constant 0 : index
    %c0_94 = arith.constant 0 : index
    %344 = vector.load %arg5[%c0_93, %c0_94] : memref<16x128xf32, #tpu.memory_space<vmem>>, vector<16x128xf32>
    tpu.vector_store %arg5[%c0_93, %c0_94], %343 {strides = array<i32>} : memref<16x128xf32, #tpu.memory_space<vmem>>, vector<16x128xf32>,
    return
  }
}

</mosaic_0001>

<bundles_post_ra>
// kernel: transformer_forward.1
= control target key start
LH: loop header
LB: loop body
LE: loop exit
PB: predicated region body
PF: predicated region fallthrough
CT: control target
= control target key end

     0   :  { %v3795_v0 = vmov 0   ;;  %v25_v15 = vlaneseq  ;;  %vm47_vm0 = vcmask 523264   ;;  %v3796_v18 = vmov 0.0   ;;  %s3797_s8 = smov 80   ;;  %s3798_s9 = smov 88   ;;  %s4451_s0 = inlined_call_operand.vmem [shape: s32[16,1], index: 0, kind: input, shape index: {}]   ;;  %s4452_s3 = inlined_call_operand.vmem [shape: f32[320,32], index: 3, kind: input, shape index: {}]   ;;  %s4453_s1 = inlined_call_operand.vmem [shape: f32[16,48], index: 1, kind: input, shape index: {}]   ;;  %s4454_s2 = inlined_call_operand.vmem [shape: f32[32,768], index: 2, kind: input, shape index: {}]   ;;  %s4455_s4 = inlined_call_operand.vmem [shape: f32[24,128], index: 4, kind: input, shape index: {}]   ;;  %s4456_s5 = inlined_call_operand.vmem [shape: f32[16,128], index: 5, kind: output, shape index: {}]  }
   0x1   :  { %3602 = vset.pattern.permute.xlu0 %v3795_v0  ;;  %v23_v1 = vld [vmem:[%s4451_s0] sm:$0xff]  ;;  %v38_v3 = vld [vmem:[%s4452_s3 + $0x8] sm:$0xff]  ;;  %v39_v4 = vld [vmem:[%s4452_s3 + $0x10] sm:$0xff]  ;;  %vm161_vm3 = vcmask 261120   ;;  %vm394_vm8 = vcmask 64512   ;;  %s3799_s10 = smov 96  }
   0x2   :  { %v37_v2 = vld [vmem:[%s4452_s3] sm:$0xff]  ;;  %28 = vperm.xlu0 %3602, %v23_v1   ;;  %v40_v5 = vld [vmem:[%s4452_s3 + $0x18] sm:$0xff]  ;;  %v24_v6 = vld [vmem:[%s4451_s0 + $0x8] sm:$0xff]  ;;  %v26_v16 = vand.u32 127, %v25_v15  ;;  %v3922_v60 = vshrl.u32 %v25_v15, 7  ;;  %s3800_s0 = smov 120  }
   0x3   :  { %v3363_v7 = vpack.c.bf16 %v38_v3, %v37_v2  ;;  %v3367_v8 = vpack.c.bf16 %v40_v5, %v39_v4  ;;  %v41_v9 = vld [vmem:[%s4452_s3 + $0x20] sm:$0xff]  ;;  %v42_v10 = vld [vmem:[%s4452_s3 + $0x28] sm:$0xff]  ;;  %v43_v12 = vld [vmem:[%s4452_s3 + $0x30] sm:$0xff]  ;;  %s3801_s11 = smov 72   ;;  %s3802_s12 = smov 112   ;;  %vm478_vm10 = vcmask 130048  }
   0x4   :  { %v3371_v11 = vpack.c.bf16 %v42_v10, %v41_v9  ;;  %v44_v13 = vld [vmem:[%s4452_s3 + $0x38] sm:$0xff]  ;;  %v3870_v23 = vld [vmem:[%s4453_s1] sm:$0xff]  ;;  %v3875_v27 = vld [vmem:[%s4453_s1 + $0x8] sm:$0xff]  ;;  %v3925_v2 = vsub.s32 0, %v3922_v60  ;;  %s3803_s13 = smov 104   ;;  %s3804_s14 = smov 64  }
   0x5   :  { %3364 = vmatprep.subr.bf16.mxu1 %v3363_v7  ;;  %v3375_v14 = vpack.c.bf16 %v44_v13, %v43_v12  ;;  %v3894_v42 = vld [vmem:[%s4454_s2 + $0x28] sm:$0xff]  ;;  %v3899_v43 = vld [vmem:[%s4454_s2 + $0x58] sm:$0xff]  ;;  %v137_v48 = vld [vmem:[%s4454_s2] sm:$0xff]  ;;  %s3805_s15 = smov 32  }
   0x6   :  { %31 = vperm.xlu0 %3602, %v24_v6   ;;  %3366 = vmatpush3.bf16.msra.mxu1 %v3363_v7  ;;  %v3904_v44 = vld [vmem:[%s4454_s2 + $0x88] sm:$0xff]  ;;  %v3379_v45 = vpack.c.bf16 %v3899_v43, %v3894_v42  ;;  %v3911_v46 = vld [vmem:[%s4454_s2 + $0xb8] sm:$0xff]  ;;  %v138_v49 = vld [vmem:[%s4454_s2 + $0x30] sm:$0xff]  ;;  %v3935_v7 = vsub.s32 1, %v3922_v60 }
   0x7   :  { %3368 = vmatprep.subr.bf16.mxu1 %v3367_v8  ;;  %v3383_v47 = vpack.c.bf16 %v3911_v46, %v3904_v44  ;;  %v3387_v50 = vpack.c.bf16 %v138_v49, %v137_v48  ;;  %v3930_v4 = vld [vmem:[%s4455_s4] sm:$0xff]  ;;  %vm3980_vm9 = vmpackc.low %vm394_vm8, %vm394_vm8 }
   0x8   :  { %v201_v6 = vrot.slane %v3930_v4, %v3925_v2  ;;  %v213_v9 = vrot.slane %v3930_v4, %v3935_v7  ;;  %v139_v15 = vld [vmem:[%s4454_s2 + $0x60] sm:$0xff] }
   0xa   :  { %3370 = vmatpush3.bf16.msra.mxu1 %v3367_v8 }
   0xb   :  { %3372 = vmatprep.subr.bf16.mxu1 %v3371_v11 }
   0xe   :  { %3374 = vmatpush3.bf16.msra.mxu1 %v3371_v11 }
   0xf   :  { %3376 = vmatprep.subr.bf16.mxu1 %v3375_v14 }
  0x12   :  { %3378 = vmatpush3.bf16.msra.mxu1 %v3375_v14 }
  0x13   :  { %3380 = vmatprep.subr.bf16.mxu1 %v3379_v45 }
  0x81   :  { %v29_v17 = vpop.permute.xlu0 %28 }
  0x82   :  { %vm33_vm1 = vcmp.eq.s32.totalorder %v26_v16, %v29_v17 }
  0x83   :  { %v35_v19 = vsel %vm33_vm1, 1.0, %v3796_v18 }
  0x84   :  { %3101 = vmatprep.mubr.msk.f32.mxu1 %vm47_vm0, %v35_v19 }
  0x85   :  { %v32_v20 = vpop.permute.xlu0 %31 }
  0x86   :  { %vm34_vm2 = vcmp.eq.s32.totalorder %v26_v16, %v32_v20  ;;  %v140_v16 = vld [vmem:[%s4454_s2 + $0x90] sm:$0xff]  ;;  %v3950_v20 = vsub.s32 2, %v3922_v60 }
  0x87   :  { %v36_v21 = vsel %vm34_vm2, 1.0, %v3796_v18  ;;  %v3391_v19 = vpack.c.bf16 %v140_v16, %v139_v15 }
  0x88   :  { %3102 = vmatmul.mubr.msk.f32.vlgmr.msra.gmra.mrb[0].mxu1 %vm47_vm0, %v36_v21  ;;  %v219_v21 = vrot.slane %v3930_v4, %v3950_v20 }
  0x89   :  { %3382 = vmatpush3.bf16.msra.mxu1 %v3379_v45 }
  0x8a   :  { %3384 = vmatprep.subr.bf16.mxu1 %v3383_v47 }
  0x8d   :  { %3386 = vmatpush3.bf16.msra.mxu1 %v3383_v47 }
  0x8e   :  { %3388 = vmatprep.subr.bf16.mxu1 %v3387_v50 }
 0x15b   :  { %v3103_v22 = vpop.f32.mrb[0].mxu1 }
 0x15c   :  { %v120_v24 = vpop.f32.mrb[1].mxu1  ;;  %v130_v25 = vmul.f32 5.656854, %v3103_v22 }
 0x15d   :  { %v129_v26 = vmul.f32 5.656854, %v120_v24 }
 0x15e   :  { %v3881_v29 = vadd.f32 %v130_v25, %v3875_v27 }
 0x15f   :  { %v3878_v28 = vadd.f32 %v129_v26, %v3870_v23  ;;  %v3955_v26 = vsub.s32 3, %v3922_v60 }
 0x160   :  { %v165_v31 = vsel %vm161_vm3, %v3881_v29, 0.0 }
 0x161   :  { %v162_v30 = vsel %vm161_vm3, %v3878_v28, 0.0 }
 0x162   :  { %163 = vadd.xlane.f32.xlu1 %v162_v30 }
 0x166   :  { %166 = vadd.xlane.f32.xlu1 %v165_v31 }
 0x1ef   :  { %v164_v32 = vpop.xlane.xlu1 %163 }
 0x1f0   :  { %v169_v33 = vmul.f32 0.03125, %v164_v32  ;;  %v304_v32 = vrot.slane %v3930_v4, %v3955_v26 }
 0x1f2   :  { %v171_v34 = vsub.f32 %v3878_v28, %v169_v33 }
 0x1f3   :  { %v167_v35 = vpop.xlane.xlu1 %166 }
 0x1f4   :  { %v170_v36 = vmul.f32 0.03125, %v167_v35  ;;  %v173_v37 = vmul.f32 %v171_v34, %v171_v34  ;;  %v202_v8 = vmul.f32 %v201_v6, %v171_v34 }
 0x1f6   :  { %v172_v38 = vsub.f32 %v3881_v29, %v170_v36  ;;  %v175_v39 = vsel %vm161_vm3, %v173_v37, 0.0 }
 0x1f7   :  { %176 = vadd.xlane.f32.xlu0 %v175_v39 }
 0x1f8   :  { %v174_v40 = vmul.f32 %v172_v38, %v172_v38  ;;  %v203_v12 = vmul.f32 %v201_v6, %v172_v38 }
 0x1fa   :  { %v178_v41 = vsel %vm161_vm3, %v174_v40, 0.0 }
 0x1fb   :  { %179 = vadd.xlane.f32.xlu1 %v178_v41 }
 0x284   :  { %v177_v51 = vpop.xlane.xlu0 %176 }
 0x285   :  { %v182_v52 = vmul.f32 0.032258064, %v177_v51 }
 0x287   :  { %3683 = vrsqrt.f32 %v182_v52  ;;  %vm186_vm4 = vcmp.eq.f32.partialorder %v182_v52, inf  ;;  %v189_v57 = vand.u32 2147483648, %v182_v52  ;;  %vm188_vm5 = vcmp.eq.f32.partialorder %v182_v52, 0.0 }
 0x288   :  { %v180_v53 = vpop.xlane.xlu1 %179 }
 0x289   :  { %v183_v54 = vmul.f32 0.032258064, %v180_v53 }
 0x28b   :  { %3685 = vrsqrt.f32 %v183_v54  ;;  %vm193_vm6 = vcmp.eq.f32.partialorder %v183_v54, inf  ;;  %v196_v0 = vand.u32 2147483648, %v183_v54  ;;  %vm195_vm7 = vcmp.eq.f32.partialorder %v183_v54, 0.0 }
 0x291   :  { %v3684_v55 = vpop.eup %3683 }
 0x292   :  { %v185_v56 = vmul.f32 %v3684_v55, %v182_v52 }
 0x294   :  { %v187_v58 = vsel %vm186_vm4, %v182_v52, %v185_v56 }
 0x295   :  { %v3686_v59 = vpop.eup %3685  ;;  %v190_v61 = vsel %vm188_vm5, %v189_v57, %v187_v58 }
 0x296   :  { %v192_v62 = vmul.f32 %v3686_v59, %v183_v54  ;;  %v204_v63 = vadd.f32 1e-06, %v190_v61 }
 0x298   :  { %v194_v1 = vsel %vm193_vm6, %v183_v54, %v192_v62  ;;  %3687 = vrcp.f32 %v204_v63 }
 0x299   :  { %v197_v3 = vsel %vm195_vm7, %v196_v0, %v194_v1 }
 0x29a   :  { %v205_v5 = vadd.f32 1e-06, %v197_v3 }
 0x29c   :  { %3689 = vrcp.f32 %v205_v5 }
 0x2a2   :  { %v3688_v10 = vpop.eup %3687 }
 0x2a3   :  { %v207_v11 = vmul.f32 %v3688_v10, %v202_v8 }
 0x2a5   :  { %v214_v13 = vadd.f32 %v213_v9, %v207_v11 }
 0x2a6   :  { %v3690_v14 = vpop.eup %3689 }
 0x2a7   :  { %v209_v17 = vmul.f32 %v3690_v14, %v203_v12  ;;  %3112 = vmatprep.mubr.msk.f32.mxu1 %vm161_vm3, %v214_v13 }
 0x2a9   :  { %v215_v18 = vadd.f32 %v213_v9, %v209_v17 }
 0x2ab   :  { %3113 = vmatmul.mubr.msk.f32.vlgmr.msra.gmra.mrb[2].mxu1 %vm161_vm3, %v215_v18 }
 0x2ac   :  { %3390 = vmatpush3.bf16.msra.mxu1 %v3387_v50  ;;  %3123 = vmatprep.mubr.msk.f32.mxu1 %vm161_vm3, %v214_v13 }
 0x2ad   :  { %3392 = vmatprep.subr.bf16.mxu1 %v3391_v19 }
 0x2b0   :  { %3394 = vmatpush3.bf16.msra.mxu1 %v3391_v19 }
 0x2b3   :  { %3124 = vmatmul.mubr.msk.f32.vlgmr.msra.gmra.mrb[4].mxu1 %vm161_vm3, %v215_v18 }
 0x37e   :  { %v3114_v22 = vpop.f32.mrb[2].mxu1 }
 0x37f   :  { %v298_v24 = vadd.f32 %v3114_v22, %v219_v21  ;;  %v292_v25 = vpop.f32.mrb[3].mxu1 }
 0x380   :  { %v293_v30 = vadd.f32 %v292_v25, %v219_v21 }
 0x382   :  { %3130 = vmatprep.mubr.msk.f32.mxu0 %vm394_vm8, %v293_v30  ;;  %v3613_v31 = vpack.i.bf16 %v298_v24, %v293_v30 }
 0x384   :  { %3614 = vrot.lane.b32.xlu0 %v3613_v31, %s3797_s8  ;;  %3604 = vrot.lane.b32.xlu1 %v3613_v31, %s3798_s9 }
 0x386   :  { %v3125_v33 = vpop.f32.mrb[4].mxu1 }
 0x387   :  { %v377_v34 = vadd.f32 %v3125_v33, %v304_v32  ;;  %v371_v35 = vpop.f32.mrb[5].mxu1 }
 0x388   :  { %v372_v36 = vadd.f32 %v371_v35, %v304_v32  ;;  %3609 = vrot.lane.b32.xlu1 %v3613_v31, %s3799_s10  ;;  %388 = vrot.lane.b32.xlu0 %v3870_v23, %s3799_s10 }
 0x38a   :  { %v3965_v37 = vpack.i.bf16 %v377_v34, %v372_v36  ;;  %v3967_v38 = vpack.c.bf16 %v377_v34, %v372_v36 }
 0x38c   :  { %501 = vrot.lane.b32.xlu1 %v293_v30, %s3800_s0 }
 0x390   :  { %503 = vrot.lane.b32.xlu1 %v298_v24, %s3800_s0 }
 0x394   :  { %3619 = vrot.lane.b32.xlu1 %v3613_v31, %s3801_s11 }
 0x398   :  { %784 = vrot.lane.b32.xlu1 %v293_v30, %s3802_s12 }
 0x39c   :  { %786 = vrot.lane.b32.xlu1 %v298_v24, %s3802_s12 }
 0x3a0   :  { %986 = vrot.lane.b32.xlu1 %v293_v30, %s3803_s13 }
 0x3a4   :  { %988 = vrot.lane.b32.xlu1 %v298_v24, %s3803_s13 }
 0x3a8   :  { %390 = vrot.lane.b32.xlu1 %v3875_v27, %s3799_s10 }
 0x3f6   :  { %v3615_v23 = vpop.permute.xlu0 %3614  ;;  %v3605_v39 = vpop.permute.xlu1 %3604 }
 0x3f7   :  { %v3617_v40 = vunpack.i.h.bf16 %v3615_v23  ;;  %v3616_v41 = vunpack.i.l.bf16 %v3615_v23  ;;  %v3607_v45 = vunpack.i.h.bf16 %v3605_v39  ;;  %v3606_v47 = vunpack.i.l.bf16 %v3605_v39 }
 0x3f9   :  { %v3401_v49 = vpack.c.bf16 %v3607_v45, %v3606_v47  ;;  %v3415_v51 = vpack.c.bf16 %v3617_v40, %v3616_v41 }
 0x3fa   :  { %v3610_v50 = vpop.permute.xlu1 %3609  ;;  %v4009_v3 = vpop.permute.xlu0 %388 }
 0x3fb   :  { %v3612_v52 = vunpack.i.h.bf16 %v3610_v50  ;;  %v3611_v53 = vunpack.i.l.bf16 %v3610_v50  ;;  %3403 = vmatprep.subr.msk.bf16.mxu1 %vm3980_vm9, %v3401_v49 }
 0x3fc   :  { %3406 = vmatpush3.bf16.xpose.msk.msra.mxu1 %vm3980_vm9, %v3401_v49 }
 0x3fd   :  { %3417 = vmatprep.subr.msk.bf16.mxu1 %vm3980_vm9, %v3415_v51  ;;  %v3395_v27 = vpack.c.bf16 %v3612_v52, %v3611_v53 }
 0x3fe   :  { %v502_v54 = vpop.permute.xlu1 %501 }
 0x3ff   :  { %3397 = vmatprep.subr.msk.bf16.mxu0 %vm3980_vm9, %v3395_v27  ;;  %3137 = vmatprep.mubr.msk.f32.mxu1 %vm394_vm8, %v502_v54 }
 0x400   :  { %3400 = vmatpush3.bf16.xpose.msk.msra.mxu0 %vm3980_vm9, %v3395_v27 }
 0x402   :  { %v504_v55 = vpop.permute.xlu1 %503 }
 0x403   :  { %3138 = vmatmul.mubr.msk.f32.vlgmr.msra.gmra.mrb[6].mxu1 %vm394_vm8, %v504_v55 }
 0x404   :  { %3420 = vmatpush3.bf16.xpose.msk.msra.mxu1 %vm3980_vm9, %v3415_v51 }
 0x406   :  { %v3620_v56 = vpop.permute.xlu1 %3619 }
 0x407   :  { %v3622_v57 = vunpack.i.h.bf16 %v3620_v56  ;;  %v3621_v58 = vunpack.i.l.bf16 %v3620_v56  ;;  %3131 = vmatmul.mubr.msk.f32.vlgmr.msra.gmra.mrb[0].mxu0 %vm394_vm8, %v298_v24 }
 0x409   :  { %v3425_v59 = vpack.c.bf16 %v3622_v57, %v3621_v58 }
 0x40a   :  { %v785_v61 = vpop.permute.xlu1 %784 }
 0x40b   :  { %3158 = vmatprep.mubr.msk.f32.mxu1 %vm394_vm8, %v785_v61  ;;  %3427 = vmatprep.subr.msk.bf16.mxu1 %vm3980_vm9, %v3425_v59 }
 0x40e   :  { %v787_v62 = vpop.permute.xlu1 %786 }
 0x40f   :  { %3159 = vmatmul.mubr.msk.f32.vlgmr.msra.gmra.mrb[8].mxu1 %vm394_vm8, %v787_v62 }
 0x410   :  { %3430 = vmatpush3.bf16.xpose.msk.msra.mxu1 %vm3980_vm9, %v3425_v59 }
 0x412   :  { %v987_v63 = vpop.permute.xlu1 %986 }
 0x413   :  { %3172 = vmatprep.mubr.msk.f32.mxu1 %vm394_vm8, %v987_v63 }
 0x416   :  { %v989_v0 = vpop.permute.xlu1 %988 }
 0x417   :  { %3173 = vmatmul.mubr.msk.f32.vlgmr.msra.gmra.mrb[10].mxu1 %vm394_vm8, %v989_v0 }
 0x41a   :  { %v4007_v1 = vpop.permute.xlu1 %390 }
 0x4d6   :  { %v3139_v5 = vpop.f32.mrb[6].mxu1 }
 0x4d7   :  { %v589_v6 = vadd.f32 %v3139_v5, %v4007_v1  ;;  %v583_v8 = vpop.f32.mrb[7].mxu1 }
 0x4d8   :  { %v584_v9 = vadd.f32 %v583_v8, %v4009_v3 }
 0x4d9   :  { %v595_v10 = vsel %vm478_vm10, %v589_v6, -inf }
 0x4da   :  { %596 = vmax.xlane.f32.xlu1 %v595_v10  ;;  %v3132_v11 = vpop.f32.mrb[0].mxu0  ;;  %v592_v12 = vsel %vm478_vm10, %v584_v9, -inf }
 0x4db   :  { %593 = vmax.xlane.f32.xlu0 %v592_v12  ;;  %v469_v13 = vpop.f32.mrb[1].mxu0  ;;  %v475_v15 = vadd.f32 %v3132_v11, %v4007_v1 }
 0x4dc   :  { %v4016_v14 = vadd.f32 %v469_v13, %v4009_v3 }
 0x4dd   :  { %v482_v18 = vsel %vm478_vm10, %v475_v15, -inf }
 0x4de   :  { %v479_v16 = vsel %vm478_vm10, %v4016_v14, -inf }
 0x4df   :  { %480 = vmax.xlane.f32.xlu0 %v479_v16 }
 0x4e2   :  { %v3160_v17 = vpop.f32.mrb[8].mxu1 }
 0x4e3   :  { %v872_v19 = vadd.f32 %v3160_v17, %v4007_v1  ;;  %v866_v21 = vpop.f32.mrb[9].mxu1  ;;  %483 = vmax.xlane.f32.xlu0 %v482_v18 }
 0x4e4   :  { %v867_v22 = vadd.f32 %v866_v21, %v4009_v3 }
 0x4e5   :  { %v878_v24 = vsel %vm478_vm10, %v872_v19, -inf }
 0x4e6   :  { %v875_v25 = vsel %vm478_vm10, %v867_v22, -inf }
 0x4e7   :  { %876 = vmax.xlane.f32.xlu1 %v875_v25  ;;  %879 = vmax.xlane.f32.xlu0 %v878_v24 }
 0x4ea   :  { %v3174_v30 = vpop.f32.mrb[10].mxu1 }
 0x4eb   :  { %v1074_v31 = vadd.f32 %v3174_v30, %v4007_v1  ;;  %v1068_v32 = vpop.f32.mrb[11].mxu1 }
 0x4ec   :  { %v1069_v33 = vadd.f32 %v1068_v32, %v4009_v3 }
 0x4ed   :  { %v1080_v34 = vsel %vm478_vm10, %v1074_v31, -inf }
 0x4ee   :  { %1081 = vmax.xlane.f32.xlu0 %v1080_v34  ;;  %v1077_v35 = vsel %vm478_vm10, %v1069_v33, -inf }
 0x4ef   :  { %1078 = vmax.xlane.f32.xlu1 %v1077_v35 }
 0x567   :  { %v597_v36 = vpop.xlane.xlu1 %596 }
 0x568   :  { %v599_v23 = vsub.f32 %v589_v6, %v597_v36  ;;  %v594_v39 = vpop.xlane.xlu0 %593 }
 0x569   :  { %v598_v40 = vsub.f32 %v584_v9, %v594_v39 }
 0x56a   :  { %v602_v41 = vmul.f32 1.442695, %v599_v23 }
 0x56b   :  { %v600_v45 = vmul.f32 1.442695, %v598_v40 }
 0x56c   :  { %3691 = vpow2.f32 %v602_v41  ;;  %v481_v47 = vpop.xlane.xlu0 %480 }
 0x56d   :  { %3693 = vpow2.f32 %v600_v45  ;;  %v485_v16 = vsub.f32 %v4016_v14, %v481_v47 }
 0x56f   :  { %v487_v17 = vmul.f32 1.442695, %v485_v16 }
 0x570   :  { %v484_v49 = vpop.xlane.xlu0 %483 }
 0x571   :  { %v486_v50 = vsub.f32 %v475_v15, %v484_v49 }
 0x573   :  { %v489_v51 = vmul.f32 1.442695, %v486_v50 }
 0x574   :  { %v880_v52 = vpop.xlane.xlu0 %879  ;;  %v877_v57 = vpop.xlane.xlu1 %876 }
 0x575   :  { %3695 = vpow2.f32 %v489_v51  ;;  %v882_v53 = vsub.f32 %v872_v19, %v880_v52  ;;  %v881_v18 = vsub.f32 %v867_v22, %v877_v57 }
 0x576   :  { %v3692_v27 = vpop.eup %3691 }
 0x577   :  { %v3694_v54 = vpop.eup %3693  ;;  %v885_v55 = vmul.f32 1.442695, %v882_v53  ;;  %v607_v56 = vsel %vm478_vm10, %v3692_v27, 0.0  ;;  %v883_v19 = vmul.f32 1.442695, %v881_v18 }
 0x578   :  { %608 = vadd.xlane.f32.xlu0 %v607_v56  ;;  %v604_v58 = vsel %vm478_vm10, %v3694_v54, 0.0 }
 0x579   :  { %605 = vadd.xlane.f32.xlu1 %v604_v58  ;;  %3697 = vpow2.f32 %v885_v55 }
 0x57b   :  { %v1082_v59 = vpop.xlane.xlu0 %1081 }
 0x57c   :  { %v1084_v61 = vsub.f32 %v1074_v31, %v1082_v59  ;;  %v1079_v62 = vpop.xlane.xlu1 %1078 }
 0x57d   :  { %v1083_v63 = vsub.f32 %v1069_v33, %v1079_v62 }
 0x57e   :  { %v1087_v0 = vmul.f32 1.442695, %v1084_v61 }
 0x57f   :  { %v4032_v5 = vpop.eup %3695  ;;  %v1085_v6 = vmul.f32 1.442695, %v1083_v63 }
 0x580   :  { %3699 = vpow2.f32 %v1087_v0  ;;  %v494_v8 = vsel %vm478_vm10, %v4032_v5, 0.0 }
 0x581   :  { %495 = vadd.xlane.f32.xlu0 %v494_v8  ;;  %3701 = vpow2.f32 %v1085_v6 }
 0x582   :  { %3703 = vpow2.f32 %v487_v17 }
 0x583   :  { %v4036_v9 = vpop.eup %3697  ;;  %3705 = vpow2.f32 %v883_v19 }
 0x584   :  { %v890_v10 = vsel %vm478_vm10, %v4036_v9, 0.0 }
 0x585   :  { %891 = vadd.xlane.f32.xlu0 %v890_v10 }
 0x58a   :  { %v4040_v11 = vpop.eup %3699  ;;  %3624 = vrot.lane.b32.xlu1 %v3965_v37, %s3799_s10 }
 0x58b   :  { %v1092_v12 = vsel %vm478_vm10, %v4040_v11, 0.0  ;;  %v4046_v13 = vpop.eup %3701 }
 0x58c   :  { %1093 = vadd.xlane.f32.xlu0 %v1092_v12  ;;  %v1089_v15 = vsel %vm478_vm10, %v4046_v13, 0.0  ;;  %v3704_v21 = vpop.eup %3703  ;;  %v4072_v12 = vsub.s32 4, %v3922_v60 }
 0x58d   :  { %v491_v24 = vsel %vm478_vm10, %v3704_v21, 0.0  ;;  %v3706_v25 = vpop.eup %3705 }
 0x58e   :  { %v887_v30 = vsel %vm478_vm10, %v3706_v25, 0.0 }
 0x590   :  { %1090 = vadd.xlane.f32.xlu0 %v1089_v15  ;;  %v1193_v15 = vrot.slane %v3930_v4, %v4072_v12 }
 0x5a6   :  { %3629 = vrot.lane.b32.xlu0 %v3965_v37, %s3804_s14 }
 0x5ae   :  { %492 = vadd.xlane.f32.xlu1 %v491_v24 }
 0x5b2   :  { %888 = vadd.xlane.f32.xlu1 %v887_v30 }
 0x5c3   :  { %3634 = vrot.lane.b32.xlu1 %v3965_v37, %s3805_s15 }
 0x605   :  { %v609_v14 = vpop.xlane.xlu0 %608 }
 0x606   :  { %3707 = vrcp.f32 %v609_v14  ;;  %v606_v22 = vpop.xlane.xlu1 %605 }
 0x607   :  { %3709 = vrcp.f32 %v606_v22 }
 0x60a   :  { %v3625_v31 = vpop.permute.xlu1 %3624 }
 0x60b   :  { %v3627_v32 = vunpack.i.h.bf16 %v3625_v31  ;;  %v3626_v33 = vunpack.i.l.bf16 %v3625_v31 }
 0x60d   :  { %v3407_v34 = vpack.c.bf16 %v3627_v32, %v3626_v33 }
 0x60e   :  { %v496_v35 = vpop.xlane.xlu0 %495 }
 0x60f   :  { %3408 = vmatprep.subr.bf16.mxu0 %v3407_v34  ;;  %3711 = vrcp.f32 %v496_v35  ;;  %v142_v35 = vld [vmem:[%s4454_s2 + $0x40] sm:$0xff] }
 0x610   :  { %v3708_v36 = vpop.eup %3707  ;;  %3410 = vmatpush3.bf16.msra.mxu0 %v3407_v34  ;;  %v141_v34 = vld [vmem:[%s4454_s2 + $0x10] sm:$0xff] }
 0x611   :  { %v3710_v23 = vpop.eup %3709  ;;  %3412 = vmatprep.subr.bf16.mxu0 %v3967_v38  ;;  %v613_v40 = vmul.f32 %v3708_v36, %v3692_v27  ;;  %v143_v36 = vld [vmem:[%s4454_s2 + $0x70] sm:$0xff] }
 0x612   :  { %v612_v39 = vmul.f32 %v3710_v23, %v3694_v54  ;;  %v892_v37 = vpop.xlane.xlu0 %891  ;;  %v3435_v23 = vpack.c.bf16 %v142_v35, %v141_v34 }
 0x614   :  { %3144 = vmatprep.mubr.msk.f32.mxu0 %vm478_vm10, %v612_v39  ;;  %v144_v39 = vld [vmem:[%s4454_s2 + $0xa0] sm:$0xff] }
 0x615   :  { %3145 = vmatmul.mubr.msk.f32.vlgmr.msra.gmra.mrb[2].mxu0 %vm478_vm10, %v613_v40  ;;  %v3439_v40 = vpack.c.bf16 %v144_v39, %v143_v36 }
 0x616   :  { %3414 = vmatpush3.bf16.msra.mxu0 %v3967_v38 }
 0x619   :  { %v1094_v41 = vpop.xlane.xlu0 %1093  ;;  %v3712_v54 = vpop.eup %3711 }
 0x61a   :  { %v500_v58 = vmul.f32 %v3712_v54, %v4032_v5  ;;  %v152_v54 = vld [vmem:[%s4452_s3 + $0x78] sm:$0xff] }
 0x61d   :  { %v1091_v45 = vpop.xlane.xlu0 %1090 }
 0x621   :  { %v3630_v47 = vpop.permute.xlu0 %3629 }
 0x622   :  { %v3632_v49 = vunpack.i.h.bf16 %v3630_v47  ;;  %v3631_v50 = vunpack.i.l.bf16 %v3630_v47 }
 0x624   :  { %v3421_v51 = vpack.c.bf16 %v3632_v49, %v3631_v50  ;;  %v148_v49 = vld [vmem:[%s4452_s3 + $0x58] sm:$0xff] }
 0x626   :  { %3422 = vmatprep.subr.bf16.mxu0 %v3421_v51 }
 0x63b   :  { %v493_v52 = vpop.xlane.xlu1 %492 }
 0x63c   :  { %3713 = vrcp.f32 %v493_v52  ;;  %v150_v52 = vld [vmem:[%s4452_s3 + $0x68] sm:$0xff] }
 0x63f   :  { %v889_v53 = vpop.xlane.xlu1 %888 }
 0x640   :  { %3715 = vrcp.f32 %v889_v53 }
 0x641   :  { %3717 = vrcp.f32 %v892_v37  ;;  %v145_v37 = vld [vmem:[%s4452_s3 + $0x40] sm:$0xff] }
 0x642   :  { %3719 = vrcp.f32 %v1091_v45  ;;  %v147_v45 = vld [vmem:[%s4452_s3 + $0x50] sm:$0xff] }
 0x643   :  { %v3635_v27 = vpop.permute.xlu1 %3634  ;;  %3721 = vrcp.f32 %v1094_v41  ;;  %v146_v41 = vld [vmem:[%s4452_s3 + $0x48] sm:$0xff]  ;;  %v3447_v50 = vpack.c.bf16 %v148_v49, %v147_v45 }
 0x644   :  { %v3637_v56 = vunpack.i.h.bf16 %v3635_v27  ;;  %v3636_v57 = vunpack.i.l.bf16 %v3635_v27  ;;  %v3443_v47 = vpack.c.bf16 %v146_v41, %v145_v37  ;;  %v151_v27 = vld [vmem:[%s4452_s3 + $0x70] sm:$0xff] }
 0x646   :  { %v3714_v55 = vpop.eup %3713  ;;  %v3431_v61 = vpack.c.bf16 %v3637_v56, %v3636_v57  ;;  %3444 = vmatprep.subr.bf16.mxu1 %v3443_v47  ;;  %v153_v56 = vld [vmem:[%s4452_s3 + $0x80] sm:$0xff]  ;;  %v154_v57 = vld [vmem:[%s4452_s3 + $0x88] sm:$0xff] }
 0x647   :  { %v499_v38 = vmul.f32 %v3714_v55, %v3704_v21  ;;  %3446 = vmatpush3.bf16.msra.mxu1 %v3443_v47  ;;  %v3455_v55 = vpack.c.bf16 %v152_v54, %v151_v27  ;;  %v160_v47 = vld [vmem:[%s4452_s3 + $0xb8] sm:$0xff] }
 0x648   :  { %3448 = vmatprep.subr.bf16.mxu1 %v3447_v50 }
 0x649   :  { %3151 = vmatprep.mubr.msk.f32.mxu0 %vm478_vm10, %v499_v38  ;;  %v3459_v38 = vpack.c.bf16 %v154_v57, %v153_v56  ;;  %v4177_v56 = vld [vmem:[%s4455_s4 + $0x8] sm:$0xff] }
 0x64a   :  { %v3716_v59 = vpop.eup %3715  ;;  %3152 = vmatmul.mubr.msk.f32.vlgmr.msra.gmra.mrb[2].mxu0 %vm478_vm10, %v500_v58  ;;  %v155_v58 = vld [vmem:[%s4452_s3 + $0x90] sm:$0xff]  ;;  %v1415_v57 = vrot.slane %v4177_v56, %v3925_v2 }
 0x64b   :  { %3424 = vmatpush3.bf16.msra.mxu0 %v3421_v51  ;;  %v895_v62 = vmul.f32 %v3716_v59, %v3706_v25  ;;  %v3718_v63 = vpop.eup %3717  ;;  %v149_v51 = vld [vmem:[%s4452_s3 + $0x60] sm:$0xff]  ;;  %3450 = vmatpush3.bf16.msra.mxu1 %v3447_v50  ;;  %v156_v59 = vld [vmem:[%s4452_s3 + $0x98] sm:$0xff] }
 0x64c   :  { %3432 = vmatprep.subr.bf16.mxu0 %v3431_v61  ;;  %v3720_v0 = vpop.eup %3719  ;;  %v896_v6 = vmul.f32 %v3718_v63, %v4036_v9  ;;  %v3451_v53 = vpack.c.bf16 %v150_v52, %v149_v51  ;;  %v158_v63 = vld [vmem:[%s4452_s3 + $0xa8] sm:$0xff] }
 0x64d   :  { %3165 = vmatprep.mubr.msk.f32.mxu0 %vm478_vm10, %v895_v62  ;;  %v1097_v8 = vmul.f32 %v3720_v0, %v4046_v13  ;;  %v3722_v5 = vpop.eup %3721  ;;  %v157_v62 = vld [vmem:[%s4452_s3 + $0xa0] sm:$0xff] }
 0x64e   :  { %v1098_v10 = vmul.f32 %v3722_v5, %v4040_v11  ;;  %3452 = vmatprep.subr.bf16.mxu1 %v3451_v53  ;;  %v3467_v0 = vpack.c.bf16 %v158_v63, %v157_v62 }
 0x64f   :  { %3454 = vmatpush3.bf16.msra.mxu1 %v3451_v53 }
 0x650   :  { %3456 = vmatprep.subr.bf16.mxu1 %v3455_v55 }
 0x652   :  { %3166 = vmatmul.mubr.msk.f32.vlgmr.msra.gmra.mrb[2].mxu0 %vm478_vm10, %v896_v6 }
 0x653   :  { %3434 = vmatpush3.bf16.msra.mxu0 %v3431_v61  ;;  %3179 = vmatprep.mubr.msk.f32.mxu0 %vm478_vm10, %v1097_v8  ;;  %v3463_v61 = vpack.c.bf16 %v156_v59, %v155_v58 }
 0x654   :  { %3436 = vmatprep.subr.bf16.mxu0 %v3435_v23  ;;  %3458 = vmatpush3.bf16.msra.mxu1 %v3455_v55 }
 0x655   :  { %3460 = vmatprep.subr.bf16.mxu1 %v3459_v38 }
 0x658   :  { %3462 = vmatpush3.bf16.msra.mxu1 %v3459_v38 }
 0x659   :  { %3464 = vmatprep.subr.bf16.mxu1 %v3463_v61 }
 0x65a   :  { %3180 = vmatmul.mubr.msk.f32.vlgmr.msra.gmra.mrb[2].mxu0 %vm478_vm10, %v1098_v10 }
 0x65b   :  { %3438 = vmatpush3.bf16.msra.mxu0 %v3435_v23 }
 0x65c   :  { %3440 = vmatprep.subr.bf16.mxu0 %v3439_v40  ;;  %3466 = vmatpush3.bf16.msra.mxu1 %v3463_v61 }
 0x65d   :  { %3468 = vmatprep.subr.bf16.mxu1 %v3467_v0 }
 0x65f   :  { %3442 = vmatpush3.bf16.msra.mxu0 %v3439_v40 }
 0x660   :  { %3470 = vmatpush3.bf16.msra.mxu1 %v3467_v0 }
 0x72d   :  { %v3181_v16 = vpop.f32.mrb[2].mxu0 }
 0x72e   :  { %v1189_v9 = vadd.f32 %v3181_v16, %v3881_v29  ;;  %v1177_v13 = vpop.f32.mrb[3].mxu0 }
 0x72f   :  { %v1188_v17 = vadd.f32 %v1177_v13, %v3878_v28 }
 0x730   :  { %v4078_v18 = vadd.f32 %v1193_v15, %v1189_v9 }
 0x731   :  { %v4080_v19 = vadd.f32 %v1193_v15, %v1188_v17 }
 0x732   :  { %v1199_v11 = vsel %vm161_vm3, %v4078_v18, 0.0 }
 0x733   :  { %1200 = vadd.xlane.f32.xlu0 %v1199_v11  ;;  %v1196_v21 = vsel %vm161_vm3, %v4080_v19, 0.0 }
 0x734   :  { %1197 = vadd.xlane.f32.xlu1 %v1196_v21 }
 0x7c0   :  { %v1201_v24 = vpop.xlane.xlu0 %1200 }
 0x7c1   :  { %v1203_v25 = vmul.f32 0.03125, %v1201_v24  ;;  %v1198_v30 = vpop.xlane.xlu1 %1197 }
 0x7c2   :  { %v1202_v14 = vmul.f32 0.03125, %v1198_v30 }
 0x7c3   :  { %v4087_v29 = vsub.f32 %v4078_v18, %v1203_v25 }
 0x7c4   :  { %v4090_v28 = vsub.f32 %v4080_v19, %v1202_v14  ;;  %v1232_v14 = vsub.s32 5, %v3922_v60 }
 0x7c5   :  { %v1207_v32 = vmul.f32 %v4087_v29, %v4087_v29 }
 0x7c6   :  { %v1206_v22 = vmul.f32 %v4090_v28, %v4090_v28 }
 0x7c7   :  { %v1211_v33 = vsel %vm161_vm3, %v1207_v32, 0.0  ;;  %v1233_v32 = vrot.slane %v3930_v4, %v1232_v14 }
 0x7c8   :  { %v1208_v31 = vsel %vm161_vm3, %v1206_v22, 0.0 }
 0x7c9   :  { %1209 = vadd.xlane.f32.xlu1 %v1208_v31  ;;  %v1234_v34 = vmul.f32 %v1233_v32, %v4090_v28  ;;  %v1235_v39 = vmul.f32 %v1233_v32, %v4087_v29  ;;  %v159_v28 = vld [vmem:[%s4452_s3 + $0xb0] sm:$0xff]  ;;  %v1250_v29 = vsub.s32 7, %v3922_v60 }
 0x7ca   :  { %v3471_v49 = vpack.c.bf16 %v160_v47, %v159_v28 }
 0x7cb   :  { %v1251_v50 = vrot.slane %v3930_v4, %v1250_v29 }
 0x7cc   :  { %3472 = vmatprep.subr.bf16.mxu1 %v3471_v49 }
 0x7cd   :  { %1212 = vadd.xlane.f32.xlu1 %v1211_v33  ;;  %v1244_v33 = vsub.s32 6, %v3922_v60  ;;  %3474 = vmatpush3.bf16.msra.mxu1 %v3471_v49 }
 0x7cf   :  { %v1245_v35 = vrot.slane %v3930_v4, %v1244_v33 }
 0x856   :  { %v1210_v6 = vpop.xlane.xlu1 %1209 }
 0x857   :  { %v1214_v8 = vmul.f32 0.032258064, %v1210_v6 }
 0x859   :  { %3723 = vrsqrt.f32 %v1214_v8  ;;  %vm1218_vm11 = vcmp.eq.f32.partialorder %v1214_v8, inf  ;;  %v1221_v9 = vand.u32 2147483648, %v1214_v8  ;;  %vm1220_vm12 = vcmp.eq.f32.partialorder %v1214_v8, 0.0 }
 0x85a   :  { %v1213_v5 = vpop.xlane.xlu1 %1212 }
 0x85b   :  { %v1215_v10 = vmul.f32 0.032258064, %v1213_v5 }
 0x85d   :  { %3725 = vrsqrt.f32 %v1215_v10  ;;  %vm1225_vm13 = vcmp.eq.f32.partialorder %v1215_v10, inf  ;;  %v1228_v25 = vand.u32 2147483648, %v1215_v10  ;;  %vm1227_vm14 = vcmp.eq.f32.partialorder %v1215_v10, 0.0 }
 0x863   :  { %v3724_v15 = vpop.eup %3723 }
 0x864   :  { %v1217_v16 = vmul.f32 %v3724_v15, %v1214_v8 }
 0x866   :  { %v1219_v13 = vsel %vm1218_vm11, %v1214_v8, %v1217_v16 }
 0x867   :  { %v3726_v17 = vpop.eup %3725  ;;  %v1222_v11 = vsel %vm1220_vm12, %v1221_v9, %v1219_v13 }
 0x868   :  { %v1224_v21 = vmul.f32 %v3726_v17, %v1215_v10  ;;  %v1236_v24 = vadd.f32 1e-06, %v1222_v11  ;;  %v3643_v17 = vpack.i.bf16 %v3911_v46, %v3904_v44  ;;  %v3638_v11 = vpack.i.bf16 %v3899_v43, %v3894_v42  ;;  %v1418_v42 = vld [vmem:[%s4454_s2 + $0x8] sm:$0xff]  ;;  %v1419_v43 = vld [vmem:[%s4454_s2 + $0x38] sm:$0xff] }
 0x86a   :  { %v1226_v30 = vsel %vm1225_vm13, %v1215_v10, %v1224_v21  ;;  %3727 = vrcp.f32 %v1236_v24 }
 0x86b   :  { %v1229_v22 = vsel %vm1227_vm14, %v1228_v25, %v1226_v30 }
 0x86c   :  { %v1237_v31 = vadd.f32 1e-06, %v1229_v22 }
 0x86e   :  { %3729 = vrcp.f32 %v1237_v31 }
 0x874   :  { %v3728_v36 = vpop.eup %3727 }
 0x875   :  { %v1239_v23 = vmul.f32 %v3728_v36, %v1234_v34 }
 0x877   :  { %v1246_v40 = vadd.f32 %v1245_v35, %v1239_v23  ;;  %v3483_v23 = vpack.c.bf16 %v1419_v43, %v1418_v42 }
 0x878   :  { %v3730_v37 = vpop.eup %3729 }
 0x879   :  { %v1241_v41 = vmul.f32 %v3730_v37, %v1235_v39  ;;  %3190 = vmatprep.mubr.msk.f32.mxu0 %vm161_vm3, %v1246_v40 }
 0x87b   :  { %v1247_v45 = vadd.f32 %v1245_v35, %v1241_v41 }
 0x87d   :  { %3191 = vmatmul.mubr.msk.f32.vlgmr.msra.gmra.mrb[4].mxu0 %vm161_vm3, %v1247_v45 }
 0x950   :  { %v3192_v51 = vpop.f32.mrb[4].mxu0 }
 0x951   :  { %v1330_v52 = vadd.f32 %v3192_v51, %v1251_v50  ;;  %v1324_v53 = vpop.f32.mrb[5].mxu0 }
 0x952   :  { %v1325_v27 = vadd.f32 %v1324_v53, %v1251_v50 }
 0x953   :  { %v1334_v55 = vmax.f32 %v1330_v52, 0.0 }
 0x954   :  { %v1333_v54 = vmax.f32 %v1325_v27, 0.0  ;;  %v1479_v27 = vrot.slane %v4177_v56, %v3935_v7 }
 0x956   :  { %3225 = vmatprep.mubr.f32.mxu1 %v1333_v54 }
 0x957   :  { %3226 = vmatmul.mubr.f32.vlgmr.msra.gmra.mrb[12].mxu1 %v1334_v55 }
 0xa2a   :  { %v3227_v38 = vpop.f32.mrb[12].mxu1 }
 0xa2b   :  { %v1411_v58 = vadd.f32 %v3227_v38, %v4078_v18  ;;  %v1401_v4 = vpop.f32.mrb[13].mxu1  ;;  %v1491_v38 = vrot.slane %v4177_v56, %v3950_v20 }
 0xa2c   :  { %v1410_v59 = vadd.f32 %v1401_v4, %v4080_v19 }
 0xa2d   :  { %v4183_v61 = vadd.f32 %v1415_v57, %v1411_v58 }
 0xa2e   :  { %v4185_v62 = vadd.f32 %v1415_v57, %v1410_v59 }
 0xa2f   :  { %v1445_v63 = vsel %vm161_vm3, %v4183_v61, 0.0 }
 0xa30   :  { %1446 = vadd.xlane.f32.xlu1 %v1445_v63  ;;  %v1442_v0 = vsel %vm161_vm3, %v4185_v62, 0.0  ;;  %v1420_v63 = vld [vmem:[%s4454_s2 + $0x68] sm:$0xff] }
 0xa31   :  { %1443 = vadd.xlane.f32.xlu0 %v1442_v0  ;;  %v1421_v0 = vld [vmem:[%s4454_s2 + $0x98] sm:$0xff] }
 0xabd   :  { %v1447_v6 = vpop.xlane.xlu1 %1446 }
 0xabe   :  { %v1449_v8 = vmul.f32 0.03125, %v1447_v6  ;;  %v1444_v5 = vpop.xlane.xlu0 %1443 }
 0xabf   :  { %v1448_v10 = vmul.f32 0.03125, %v1444_v5  ;;  %v3487_v5 = vpack.c.bf16 %v1421_v0, %v1420_v63 }
 0xac0   :  { %v1451_v18 = vsub.f32 %v4183_v61, %v1449_v8 }
 0xac1   :  { %v1450_v19 = vsub.f32 %v4185_v62, %v1448_v10  ;;  %v1497_v10 = vrot.slane %v4177_v56, %v3955_v26 }
 0xac2   :  { %v1453_v15 = vmul.f32 %v1451_v18, %v1451_v18  ;;  %v1481_v54 = vmul.f32 %v1479_v27, %v1451_v18 }
 0xac3   :  { %v1452_v16 = vmul.f32 %v1450_v19, %v1450_v19  ;;  %v1480_v57 = vmul.f32 %v1479_v27, %v1450_v19 }
 0xac4   :  { %v1457_v9 = vsel %vm161_vm3, %v1453_v15, 0.0 }
 0xac5   :  { %1458 = vadd.xlane.f32.xlu1 %v1457_v9  ;;  %v1454_v13 = vsel %vm161_vm3, %v1452_v16, 0.0 }
 0xac6   :  { %1455 = vadd.xlane.f32.xlu0 %v1454_v13  ;;  %v1598_v13 = vrot.slane %v4177_v56, %v4072_v12 }
 0xad6   :  { %3644 = vrot.lane.b32.xlu1 %v3643_v17, %s3804_s14 }
 0xadc   :  { %3639 = vrot.lane.b32.xlu0 %v3638_v11, %s3804_s14 }
 0xb52   :  { %v1459_v21 = vpop.xlane.xlu1 %1458 }
 0xb53   :  { %v1461_v24 = vmul.f32 0.032258064, %v1459_v21  ;;  %v1456_v25 = vpop.xlane.xlu0 %1455 }
 0xb54   :  { %v1460_v30 = vmul.f32 0.032258064, %v1456_v25 }
 0xb55   :  { %3731 = vrsqrt.f32 %v1461_v24  ;;  %vm1471_vm15 = vcmp.eq.f32.partialorder %v1461_v24, inf  ;;  %v1474_v41 = vand.u32 2147483648, %v1461_v24  ;;  %vm1473_vm0 = vcmp.eq.f32.partialorder %v1461_v24, 0.0 }
 0xb56   :  { %3733 = vrsqrt.f32 %v1460_v30  ;;  %v3645_v22 = vpop.permute.xlu1 %3644  ;;  %vm1464_vm1 = vcmp.eq.f32.partialorder %v1460_v30, inf  ;;  %v1467_v47 = vand.u32 2147483648, %v1460_v30  ;;  %vm1466_vm2 = vcmp.eq.f32.partialorder %v1460_v30, 0.0 }
 0xb57   :  { %v3640_v31 = vpop.permute.xlu0 %3639  ;;  %v3647_v32 = vunpack.i.h.bf16 %v3645_v22  ;;  %v3646_v34 = vunpack.i.l.bf16 %v3645_v22 }
 0xb58   :  { %v3642_v35 = vunpack.i.h.bf16 %v3640_v31  ;;  %v3641_v36 = vunpack.i.l.bf16 %v3640_v31 }
 0xb59   :  { %v3479_v46 = vpack.c.bf16 %v3647_v32, %v3646_v34 }
 0xb5a   :  { %v3475_v44 = vpack.c.bf16 %v3642_v35, %v3641_v36 }
 0xb5c   :  { %3476 = vmatprep.subr.bf16.mxu0 %v3475_v44 }
 0xb5d   :  { %3478 = vmatpush3.bf16.msra.mxu0 %v3475_v44 }
 0xb5e   :  { %3480 = vmatprep.subr.bf16.mxu0 %v3479_v46 }
 0xb5f   :  { %v3732_v39 = vpop.eup %3731 }
 0xb60   :  { %v3734_v40 = vpop.eup %3733  ;;  %v1470_v37 = vmul.f32 %v3732_v39, %v1461_v24 }
 0xb61   :  { %v1463_v45 = vmul.f32 %v3734_v40, %v1460_v30  ;;  %3482 = vmatpush3.bf16.msra.mxu0 %v3479_v46 }
 0xb62   :  { %v1472_v28 = vsel %vm1471_vm15, %v1461_v24, %v1470_v37  ;;  %3484 = vmatprep.subr.bf16.mxu0 %v3483_v23 }
 0xb63   :  { %v1475_v49 = vsel %vm1473_vm0, %v1474_v41, %v1472_v28  ;;  %v1465_v50 = vsel %vm1464_vm1, %v1460_v30, %v1463_v45 }
 0xb64   :  { %v1483_v51 = vadd.f32 1e-06, %v1475_v49  ;;  %v1468_v52 = vsel %vm1466_vm2, %v1467_v47, %v1465_v50 }
 0xb65   :  { %v1482_v53 = vadd.f32 1e-06, %v1468_v52 }
 0xb66   :  { %3735 = vrcp.f32 %v1483_v51 }
 0xb67   :  { %3737 = vrcp.f32 %v1482_v53 }
 0xb70   :  { %v3736_v55 = vpop.eup %3735 }
 0xb71   :  { %v3738_v58 = vpop.eup %3737  ;;  %v1487_v4 = vmul.f32 %v3736_v55, %v1481_v54 }
 0xb72   :  { %v1485_v59 = vmul.f32 %v3738_v58, %v1480_v57 }
 0xb73   :  { %v1493_v8 = vadd.f32 %v1491_v38, %v1487_v4 }
 0xb74   :  { %v1492_v6 = vadd.f32 %v1491_v38, %v1485_v59 }
 0xb76   :  { %3236 = vmatprep.mubr.msk.f32.mxu0 %vm161_vm3, %v1492_v6 }
 0xb77   :  { %3237 = vmatmul.mubr.msk.f32.vlgmr.msra.gmra.mrb[6].mxu0 %vm161_vm3, %v1493_v8 }
 0xb78   :  { %3486 = vmatpush3.bf16.msra.mxu0 %v3483_v23  ;;  %3247 = vmatprep.mubr.msk.f32.mxu0 %vm161_vm3, %v1492_v6 }
 0xb79   :  { %3488 = vmatprep.subr.bf16.mxu0 %v3487_v5 }
 0xb7c   :  { %3490 = vmatpush3.bf16.msra.mxu0 %v3487_v5 }
 0xb7f   :  { %3248 = vmatmul.mubr.msk.f32.vlgmr.msra.gmra.mrb[8].mxu0 %vm161_vm3, %v1493_v8 }
 0xc4a   :  { %v3238_v18 = vpop.f32.mrb[6].mxu0 }
 0xc4b   :  { %v4223_v19 = vadd.f32 %v3238_v18, %v1497_v10  ;;  %v1586_v15 = vpop.f32.mrb[7].mxu0 }
 0xc4c   :  { %v4225_v16 = vadd.f32 %v1586_v15, %v1497_v10 }
 0xc4e   :  { %3254 = vmatprep.mubr.msk.f32.mxu0 %vm394_vm8, %v4225_v16  ;;  %v4231_v9 = vpack.i.bf16 %v4223_v19, %v4225_v16 }
 0xc50   :  { %3654 = vrot.lane.b32.xlu0 %v4231_v9, %s3798_s9  ;;  %3649 = vrot.lane.b32.xlu1 %v4231_v9, %s3799_s10 }
 0xc52   :  { %v3249_v17 = vpop.f32.mrb[8].mxu0 }
 0xc53   :  { %v1671_v11 = vadd.f32 %v3249_v17, %v1598_v13  ;;  %v1665_v21 = vpop.f32.mrb[9].mxu0 }
 0xc54   :  { %v1666_v24 = vadd.f32 %v1665_v21, %v1598_v13  ;;  %1787 = vrot.lane.b32.xlu0 %v4223_v19, %s3800_s0  ;;  %1785 = vrot.lane.b32.xlu1 %v4225_v16, %s3800_s0 }
 0xc56   :  { %v3507_v25 = vpack.c.bf16 %v1671_v11, %v1666_v24  ;;  %v4243_v30 = vpack.i.bf16 %v1671_v11, %v1666_v24 }
 0xc58   :  { %3508 = vmatprep.subr.bf16.mxu1 %v3507_v25 }
 0xc59   :  { %3510 = vmatpush3.bf16.msra.mxu1 %v3507_v25 }
 0xcc2   :  { %v3655_v22 = vpop.permute.xlu0 %3654  ;;  %v3650_v31 = vpop.permute.xlu1 %3649 }
 0xcc3   :  { %v3657_v32 = vunpack.i.h.bf16 %v3655_v22  ;;  %v3656_v34 = vunpack.i.l.bf16 %v3655_v22  ;;  %v3652_v35 = vunpack.i.h.bf16 %v3650_v31  ;;  %v3651_v36 = vunpack.i.l.bf16 %v3650_v31 }
 0xcc5   :  { %v3491_v44 = vpack.c.bf16 %v3652_v35, %v3651_v36  ;;  %v3497_v46 = vpack.c.bf16 %v3657_v32, %v3656_v34 }
 0xcc6   :  { %v1786_v42 = vpop.permute.xlu1 %1785  ;;  %v1788_v43 = vpop.permute.xlu0 %1787 }
 0xcc7   :  { %3493 = vmatprep.subr.msk.bf16.mxu0 %vm3980_vm9, %v3491_v44 }
 0xcc8   :  { %3496 = vmatpush3.bf16.xpose.msk.msra.mxu0 %vm3980_vm9, %v3491_v44 }
 0xcc9   :  { %3499 = vmatprep.subr.msk.bf16.mxu0 %vm3980_vm9, %v3497_v46 }
 0xccf   :  { %3255 = vmatmul.mubr.msk.f32.vlgmr.msra.gmra.mrb[10].mxu0 %vm394_vm8, %v4223_v19 }
 0xcd0   :  { %3502 = vmatpush3.bf16.xpose.msk.msra.mxu0 %vm3980_vm9, %v3497_v46  ;;  %3261 = vmatprep.mubr.msk.f32.mxu0 %vm394_vm8, %v1786_v42 }
 0xcd7   :  { %3262 = vmatmul.mubr.msk.f32.vlgmr.msra.gmra.mrb[12].mxu0 %vm394_vm8, %v1788_v43 }
 0xda2   :  { %v3256_v23 = vpop.f32.mrb[10].mxu0 }
 0xda3   :  { %v1754_v39 = vpop.f32.mrb[11].mxu0  ;;  %v1760_v4 = vadd.f32 %v3256_v23, %v4007_v1 }
 0xda4   :  { %v1755_v58 = vadd.f32 %v1754_v39, %v4009_v3 }
 0xda5   :  { %v1766_v63 = vsel %vm478_vm10, %v1760_v4, -inf }
 0xda6   :  { %v1763_v59 = vsel %vm478_vm10, %v1755_v58, -inf }
 0xdaa   :  { %v3263_v40 = vpop.f32.mrb[12].mxu0 }
 0xdab   :  { %v1873_v37 = vadd.f32 %v3263_v40, %v4007_v1  ;;  %v1867_v41 = vpop.f32.mrb[13].mxu0 }
 0xdac   :  { %v1868_v45 = vadd.f32 %v1867_v41, %v4009_v3 }
 0xdad   :  { %v1879_v28 = vsel %vm478_vm10, %v1873_v37, -inf }
 0xdae   :  { %1880 = vmax.xlane.f32.xlu0 %v1879_v28  ;;  %v1876_v47 = vsel %vm478_vm10, %v1868_v45, -inf }
 0xdaf   :  { %1877 = vmax.xlane.f32.xlu1 %v1876_v47 }
 0xe3b   :  { %v1881_v49 = vpop.xlane.xlu0 %1880 }
 0xe3c   :  { %v1883_v50 = vsub.f32 %v1873_v37, %v1881_v49  ;;  %v1878_v51 = vpop.xlane.xlu1 %1877 }
 0xe3d   :  { %v1882_v52 = vsub.f32 %v1868_v45, %v1878_v51 }
 0xe3e   :  { %v1886_v53 = vmul.f32 1.442695, %v1883_v50 }
 0xe3f   :  { %v1884_v27 = vmul.f32 1.442695, %v1882_v52 }
 0xe40   :  { %3739 = vpow2.f32 %v1886_v53 }
 0xe41   :  { %3741 = vpow2.f32 %v1884_v27 }
 0xe4a   :  { %v3740_v54 = vpop.eup %3739 }
 0xe4b   :  { %v3742_v55 = vpop.eup %3741  ;;  %v1891_v57 = vsel %vm478_vm10, %v3740_v54, 0.0 }
 0xe4c   :  { %1892 = vadd.xlane.f32.xlu1 %v1891_v57  ;;  %v1888_v38 = vsel %vm478_vm10, %v3742_v55, 0.0 }
 0xe4d   :  { %1889 = vadd.xlane.f32.xlu0 %v1888_v38 }
 0xe5d   :  { %3664 = vrot.lane.b32.xlu1 %v4231_v9, %s3797_s8 }
 0xe61   :  { %2068 = vrot.lane.b32.xlu1 %v4225_v16, %s3802_s12 }
 0xe63   :  { %3659 = vrot.lane.b32.xlu0 %v4243_v30, %s3799_s10 }
 0xe67   :  { %2070 = vrot.lane.b32.xlu0 %v4223_v19, %s3802_s12 }
 0xe85   :  { %1764 = vmax.xlane.f32.xlu1 %v1763_v59 }
 0xe86   :  { %1767 = vmax.xlane.f32.xlu0 %v1766_v63 }
 0xed9   :  { %v1893_v0 = vpop.xlane.xlu1 %1892 }
 0xeda   :  { %3743 = vrcp.f32 %v1893_v0  ;;  %v1890_v6 = vpop.xlane.xlu0 %1889 }
 0xedb   :  { %3745 = vrcp.f32 %v1890_v6 }
 0xedd   :  { %v3665_v8 = vpop.permute.xlu1 %3664 }
 0xede   :  { %v3660_v5 = vpop.permute.xlu0 %3659  ;;  %v3667_v10 = vunpack.i.h.bf16 %v3665_v8  ;;  %v3666_v18 = vunpack.i.l.bf16 %v3665_v8 }
 0xedf   :  { %v3662_v15 = vunpack.i.h.bf16 %v3660_v5  ;;  %v3661_v13 = vunpack.i.l.bf16 %v3660_v5 }
 0xee0   :  { %v3511_v11 = vpack.c.bf16 %v3667_v10, %v3666_v18 }
 0xee1   :  { %v3503_v17 = vpack.c.bf16 %v3662_v15, %v3661_v13  ;;  %v2069_v31 = vpop.permute.xlu1 %2068 }
 0xee2   :  { %v2071_v32 = vpop.permute.xlu0 %2070 }
 0xee3   :  { %3504 = vmatprep.subr.bf16.mxu0 %v3503_v17 }
 0xee4   :  { %v3744_v21 = vpop.eup %3743  ;;  %3506 = vmatpush3.bf16.msra.mxu0 %v3503_v17 }
 0xee5   :  { %v3746_v24 = vpop.eup %3745  ;;  %3513 = vmatprep.subr.msk.bf16.mxu0 %vm3980_vm9, %v3511_v11  ;;  %v1897_v22 = vmul.f32 %v3744_v21, %v3740_v54 }
 0xee6   :  { %v1896_v25 = vmul.f32 %v3746_v24, %v3742_v55 }
 0xee8   :  { %3268 = vmatprep.mubr.msk.f32.mxu0 %vm478_vm10, %v1896_v25 }
 0xee9   :  { %3269 = vmatmul.mubr.msk.f32.vlgmr.msra.gmra.mrb[14].mxu0 %vm478_vm10, %v1897_v22 }
 0xeea   :  { %3282 = vmatprep.mubr.msk.f32.mxu0 %vm394_vm8, %v2069_v31 }
 0xeed   :  { %3516 = vmatpush3.bf16.xpose.msk.msra.mxu0 %vm3980_vm9, %v3511_v11 }
 0xef4   :  { %3283 = vmatmul.mubr.msk.f32.vlgmr.msra.gmra.mrb[16].mxu0 %vm394_vm8, %v2071_v32 }
 0xf12   :  { %v1765_v35 = vpop.xlane.xlu1 %1764 }
 0xf13   :  { %v1768_v34 = vpop.xlane.xlu0 %1767  ;;  %v1769_v44 = vsub.f32 %v1755_v58, %v1765_v35 }
 0xf14   :  { %v1770_v36 = vsub.f32 %v1760_v4, %v1768_v34 }
 0xf15   :  { %v1771_v23 = vmul.f32 1.442695, %v1769_v44 }
 0xf16   :  { %v1773_v42 = vmul.f32 1.442695, %v1770_v36 }
 0xf18   :  { %3747 = vpow2.f32 %v1773_v42 }
 0xf19   :  { %3749 = vpow2.f32 %v1771_v23 }
 0xf22   :  { %v3748_v28 = vpop.eup %3747 }
 0xf23   :  { %v3750_v49 = vpop.eup %3749  ;;  %v1778_v50 = vsel %vm478_vm10, %v3748_v28, 0.0 }
 0xf24   :  { %v1775_v51 = vsel %vm478_vm10, %v3750_v49, 0.0 }
 0xfbc   :  { %v4283_v46 = vpop.f32.mrb[14].mxu0 }
 0xfbd   :  { %v4285_v43 = vpop.f32.mrb[15].mxu0 }
 0xfc7   :  { %v3284_v39 = vpop.f32.mrb[16].mxu0 }
 0xfc8   :  { %v2156_v40 = vadd.f32 %v3284_v39, %v4007_v1  ;;  %v2150_v37 = vpop.f32.mrb[17].mxu0 }
 0xfc9   :  { %v2151_v41 = vadd.f32 %v2150_v37, %v4009_v3 }
 0xfca   :  { %v2162_v45 = vsel %vm478_vm10, %v2156_v40, -inf }
 0xfcb   :  { %2163 = vmax.xlane.f32.xlu1 %v2162_v45  ;;  %v2159_v47 = vsel %vm478_vm10, %v2151_v41, -inf }
 0xfcc   :  { %2160 = vmax.xlane.f32.xlu0 %v2159_v47 }
 0xfcf   :  { %1779 = vadd.xlane.f32.xlu1 %v1778_v50 }
 0xfd0   :  { %1776 = vadd.xlane.f32.xlu0 %v1775_v51 }
0x1058   :  { %v2164_v52 = vpop.xlane.xlu1 %2163 }
0x1059   :  { %v2166_v53 = vsub.f32 %v2156_v40, %v2164_v52  ;;  %v2161_v27 = vpop.xlane.xlu0 %2160 }
0x105a   :  { %v2165_v54 = vsub.f32 %v2151_v41, %v2161_v27 }
0x105b   :  { %v2169_v55 = vmul.f32 1.442695, %v2166_v53 }
0x105c   :  { %v2167_v57 = vmul.f32 1.442695, %v2165_v54  ;;  %v1780_v38 = vpop.xlane.xlu1 %1779 }
0x105d   :  { %3751 = vpow2.f32 %v2169_v55  ;;  %v1777_v58 = vpop.xlane.xlu0 %1776 }
0x105e   :  { %3753 = vpow2.f32 %v2167_v57 }
0x105f   :  { %3755 = vrcp.f32 %v1780_v38 }
0x1060   :  { %3757 = vrcp.f32 %v1777_v58 }
0x1067   :  { %v3752_v4 = vpop.eup %3751 }
0x1068   :  { %v3754_v59 = vpop.eup %3753  ;;  %v2174_v63 = vsel %vm478_vm10, %v3752_v4, 0.0 }
0x1069   :  { %v3756_v0 = vpop.eup %3755  ;;  %2175 = vadd.xlane.f32.xlu1 %v2174_v63  ;;  %v2171_v6 = vsel %vm478_vm10, %v3754_v59, 0.0 }
0x106a   :  { %v3758_v8 = vpop.eup %3757  ;;  %2172 = vadd.xlane.f32.xlu0 %v2171_v6  ;;  %v1784_v10 = vmul.f32 %v3756_v0, %v3748_v28  ;;  %v2477_v0 = vrot.slane %v4177_v56, %v1232_v14 }
0x106b   :  { %v1783_v5 = vmul.f32 %v3758_v8, %v3750_v49 }
0x106d   :  { %3275 = vmatprep.mubr.msk.f32.mxu1 %vm478_vm10, %v1783_v5 }
0x106e   :  { %3276 = vmatmul.mubr.msk.f32.vlgmr.msra.gmra.mrb[14].mxu1 %vm478_vm10, %v1784_v10 }
0x107a   :  { %3674 = vrot.lane.b32.xlu1 %v4231_v9, %s3801_s11 }
0x107e   :  { %2270 = vrot.lane.b32.xlu1 %v4225_v16, %s3803_s13 }
0x1080   :  { %3669 = vrot.lane.b32.xlu0 %v4243_v30, %s3804_s14 }
0x1084   :  { %2272 = vrot.lane.b32.xlu0 %v4223_v19, %s3803_s13 }
0x10f6   :  { %v2176_v18 = vpop.xlane.xlu1 %2175 }
0x10f7   :  { %3759 = vrcp.f32 %v2176_v18  ;;  %v2173_v15 = vpop.xlane.xlu0 %2172 }
0x10f8   :  { %3761 = vrcp.f32 %v2173_v15 }
0x10fa   :  { %v3675_v13 = vpop.permute.xlu1 %3674 }
0x10fb   :  { %v3670_v17 = vpop.permute.xlu0 %3669  ;;  %v3677_v11 = vunpack.i.h.bf16 %v3675_v13  ;;  %v3676_v21 = vunpack.i.l.bf16 %v3675_v13 }
0x10fc   :  { %v3672_v24 = vunpack.i.h.bf16 %v3670_v17  ;;  %v3671_v25 = vunpack.i.l.bf16 %v3670_v17 }
0x10fd   :  { %v3521_v22 = vpack.c.bf16 %v3677_v11, %v3676_v21 }
0x10fe   :  { %v3517_v9 = vpack.c.bf16 %v3672_v24, %v3671_v25  ;;  %v2271_v34 = vpop.permute.xlu1 %2270 }
0x10ff   :  { %v2273_v35 = vpop.permute.xlu0 %2272 }
0x1100   :  { %3518 = vmatprep.subr.bf16.mxu1 %v3517_v9 }
0x1101   :  { %v3760_v16 = vpop.eup %3759  ;;  %3520 = vmatpush3.bf16.msra.mxu1 %v3517_v9  ;;  %v1422_v9 = vld [vmem:[%s4454_s2 + $0x18] sm:$0xff] }
0x1102   :  { %v3762_v31 = vpop.eup %3761  ;;  %3523 = vmatprep.subr.msk.bf16.mxu1 %vm3980_vm9, %v3521_v22  ;;  %v2180_v32 = vmul.f32 %v3760_v16, %v3752_v4  ;;  %v1424_v16 = vld [vmem:[%s4454_s2 + $0x78] sm:$0xff] }
0x1103   :  { %v2179_v19 = vmul.f32 %v3762_v31, %v3754_v59 }
0x1105   :  { %3289 = vmatprep.mubr.msk.f32.mxu1 %vm478_vm10, %v2179_v19  ;;  %v1425_v19 = vld [vmem:[%s4454_s2 + $0xa8] sm:$0xff] }
0x1106   :  { %3290 = vmatmul.mubr.msk.f32.vlgmr.msra.gmra.mrb[14].mxu1 %vm478_vm10, %v2180_v32  ;;  %v3535_v32 = vpack.c.bf16 %v1425_v19, %v1424_v16 }
0x1107   :  { %3296 = vmatprep.mubr.msk.f32.mxu1 %vm394_vm8, %v2271_v34  ;;  %v1426_v34 = vld [vmem:[%s4452_s3 + $0xc0] sm:$0xff] }
0x110a   :  { %3526 = vmatpush3.bf16.xpose.msk.msra.mxu1 %vm3980_vm9, %v3521_v22  ;;  %v1423_v22 = vld [vmem:[%s4454_s2 + $0x48] sm:$0xff] }
0x110b   :  { %v3531_v31 = vpack.c.bf16 %v1423_v22, %v1422_v9 }
0x110d   :  { %3532 = vmatprep.subr.bf16.mxu0 %v3531_v31 }
0x110e   :  { %3534 = vmatpush3.bf16.msra.mxu0 %v3531_v31 }
0x110f   :  { %3536 = vmatprep.subr.bf16.mxu0 %v3535_v32 }
0x1111   :  { %3297 = vmatmul.mubr.msk.f32.vlgmr.msra.gmra.mrb[16].mxu1 %vm394_vm8, %v2273_v35  ;;  %v1427_v35 = vld [vmem:[%s4452_s3 + $0xc8] sm:$0xff] }
0x1112   :  { %3538 = vmatpush3.bf16.msra.mxu0 %v3535_v32 }
0x11e4   :  { %v3298_v36 = vpop.f32.mrb[16].mxu1 }
0x11e5   :  { %v2358_v44 = vadd.f32 %v3298_v36, %v4007_v1  ;;  %v2352_v42 = vpop.f32.mrb[17].mxu1  ;;  %v3539_v36 = vpack.c.bf16 %v1427_v35, %v1426_v34 }
0x11e6   :  { %v2353_v23 = vadd.f32 %v2352_v42, %v4009_v3 }
0x11e7   :  { %v2364_v39 = vsel %vm478_vm10, %v2358_v44, -inf  ;;  %3540 = vmatprep.subr.bf16.mxu0 %v3539_v36 }
0x11e8   :  { %2365 = vmax.xlane.f32.xlu0 %v2364_v39  ;;  %v2361_v40 = vsel %vm478_vm10, %v2353_v23, -inf }
0x11e9   :  { %2362 = vmax.xlane.f32.xlu1 %v2361_v40 }
0x1275   :  { %v2366_v37 = vpop.xlane.xlu0 %2365 }
0x1276   :  { %v2368_v41 = vsub.f32 %v2358_v44, %v2366_v37  ;;  %v2363_v45 = vpop.xlane.xlu1 %2362 }
0x1277   :  { %v2367_v48 = vsub.f32 %v2353_v23, %v2363_v45 }
0x1278   :  { %v2371_v28 = vmul.f32 1.442695, %v2368_v41 }
0x1279   :  { %v2369_v47 = vmul.f32 1.442695, %v2367_v48 }
0x127a   :  { %3763 = vpow2.f32 %v2371_v28 }
0x127b   :  { %3765 = vpow2.f32 %v2369_v47 }
0x1284   :  { %v3764_v49 = vpop.eup %3763 }
0x1285   :  { %v3766_v50 = vpop.eup %3765  ;;  %v2376_v1 = vsel %vm478_vm10, %v3764_v49, 0.0 }
0x1286   :  { %2377 = vadd.xlane.f32.xlu1 %v2376_v1  ;;  %v2373_v3 = vsel %vm478_vm10, %v3766_v50, 0.0 }
0x1287   :  { %2374 = vadd.xlane.f32.xlu0 %v2373_v3 }
0x129d   :  { %3679 = vrot.lane.b32.xlu0 %v4243_v30, %s3805_s15 }
0x1313   :  { %v2378_v51 = vpop.xlane.xlu1 %2377 }
0x1314   :  { %3767 = vrcp.f32 %v2378_v51  ;;  %v2375_v52 = vpop.xlane.xlu0 %2374 }
0x1315   :  { %3769 = vrcp.f32 %v2375_v52  ;;  %v2517_v52 = vrot.slane %v4177_v56, %v1244_v33 }
0x1318   :  { %v3680_v53 = vpop.permute.xlu0 %3679 }
0x1319   :  { %v3682_v27 = vunpack.i.h.bf16 %v3680_v53  ;;  %v3681_v54 = vunpack.i.l.bf16 %v3680_v53  ;;  %v2529_v53 = vrot.slane %v4177_v56, %v1250_v29  ;;  %v1430_v29 = vld [vmem:[%s4452_s3 + $0xe0] sm:$0xff]  ;;  %v1431_v56 = vld [vmem:[%s4452_s3 + $0xe8] sm:$0xff] }
0x131b   :  { %v3527_v55 = vpack.c.bf16 %v3682_v27, %v3681_v54 }
0x131d   :  { %3528 = vmatprep.subr.bf16.mxu1 %v3527_v55 }
0x131e   :  { %v3768_v57 = vpop.eup %3767  ;;  %3530 = vmatpush3.bf16.msra.mxu1 %v3527_v55 }
0x131f   :  { %v3770_v38 = vpop.eup %3769  ;;  %v2382_v4 = vmul.f32 %v3768_v57, %v3764_v49 }
0x1320   :  { %v2381_v58 = vmul.f32 %v3770_v38, %v3766_v50 }
0x1322   :  { %3303 = vmatprep.mubr.msk.f32.mxu1 %vm478_vm10, %v2381_v58 }
0x1323   :  { %3304 = vmatmul.mubr.msk.f32.vlgmr.msra.gmra.mrb[14].mxu1 %vm478_vm10, %v2382_v4  ;;  %v1428_v4 = vld [vmem:[%s4452_s3 + $0xd0] sm:$0xff] }
0x13f6   :  { %v3305_v59 = vpop.f32.mrb[14].mxu1 }
0x13f7   :  { %v3579_v30 = vadd.f32 %v3305_v59, %v4283_v46  ;;  %v2461_v63 = vpop.f32.mrb[15].mxu1  ;;  %v1429_v59 = vld [vmem:[%s4452_s3 + $0xd8] sm:$0xff] }
0x13f8   :  { %v3580_v6 = vadd.f32 %v2461_v63, %v4285_v43  ;;  %v3547_v63 = vpack.c.bf16 %v1431_v56, %v1430_v29 }
0x13f9   :  { %v2473_v8 = vadd.f32 %v3579_v30, %v4183_v61  ;;  %v3543_v30 = vpack.c.bf16 %v1429_v59, %v1428_v4 }
0x13fa   :  { %v2472_v5 = vadd.f32 %v3580_v6, %v4185_v62  ;;  %v1433_v6 = vld [vmem:[%s4452_s3 + $0xf8] sm:$0xff] }
0x13fb   :  { %v4332_v18 = vadd.f32 %v2477_v0, %v2473_v8 }
0x13fc   :  { %v4330_v10 = vadd.f32 %v2477_v0, %v2472_v5  ;;  %v1432_v0 = vld [vmem:[%s4452_s3 + $0xf0] sm:$0xff]  ;;  %v1434_v5 = vld [vmem:[%s4452_s3 + $0x100] sm:$0xff] }
0x13fd   :  { %v2483_v46 = vsel %vm161_vm3, %v4332_v18, 0.0  ;;  %v3551_v8 = vpack.c.bf16 %v1433_v6, %v1432_v0 }
0x13fe   :  { %v2480_v15 = vsel %vm161_vm3, %v4330_v10, 0.0 }
0x13ff   :  { %2481 = vadd.xlane.f32.xlu1 %v2480_v15  ;;  %v1435_v15 = vld [vmem:[%s4452_s3 + $0x108] sm:$0xff] }
0x1403   :  { %2484 = vadd.xlane.f32.xlu1 %v2483_v46  ;;  %v3555_v46 = vpack.c.bf16 %v1435_v15, %v1434_v5 }
0x148c   :  { %v2482_v13 = vpop.xlane.xlu1 %2481 }
0x148d   :  { %v2486_v14 = vmul.f32 0.03125, %v2482_v13  ;;  %v1436_v13 = vld [vmem:[%s4452_s3 + $0x110] sm:$0xff] }
0x148f   :  { %v2488_v43 = vsub.f32 %v4330_v10, %v2486_v14  ;;  %v1437_v14 = vld [vmem:[%s4452_s3 + $0x118] sm:$0xff] }
0x1490   :  { %v2485_v17 = vpop.xlane.xlu1 %2484 }
0x1491   :  { %v2487_v61 = vmul.f32 0.03125, %v2485_v17  ;;  %v2490_v11 = vmul.f32 %v2488_v43, %v2488_v43  ;;  %v2518_v27 = vmul.f32 %v2517_v52, %v2488_v43  ;;  %v3559_v43 = vpack.c.bf16 %v1437_v14, %v1436_v13  ;;  %v1438_v17 = vld [vmem:[%s4452_s3 + $0x120] sm:$0xff] }
0x1493   :  { %v2489_v62 = vsub.f32 %v4332_v18, %v2487_v61  ;;  %v2492_v21 = vsel %vm161_vm3, %v2490_v11, 0.0  ;;  %v1439_v61 = vld [vmem:[%s4452_s3 + $0x128] sm:$0xff] }
0x1494   :  { %2493 = vadd.xlane.f32.xlu1 %v2492_v21  ;;  %v3563_v11 = vpack.c.bf16 %v1439_v61, %v1438_v17  ;;  %v1441_v21 = vld [vmem:[%s4452_s3 + $0x138] sm:$0xff] }
0x1495   :  { %v2491_v24 = vmul.f32 %v2489_v62, %v2489_v62  ;;  %v2519_v57 = vmul.f32 %v2517_v52, %v2489_v62  ;;  %v1440_v62 = vld [vmem:[%s4452_s3 + $0x130] sm:$0xff] }
0x1497   :  { %v2495_v25 = vsel %vm161_vm3, %v2491_v24, 0.0  ;;  %v3567_v24 = vpack.c.bf16 %v1441_v21, %v1440_v62 }
0x1498   :  { %2496 = vadd.xlane.f32.xlu1 %v2495_v25  ;;  %v4413_v25 = vld [vmem:[%s4455_s4 + $0x10] sm:$0xff] }
0x1499   :  { %v2535_v9 = vrot.slane %v4413_v25, %v3925_v2  ;;  %v2739_v5 = vrot.slane %v4413_v25, %v3950_v20  ;;  %v2761_v21 = vrot.slane %v4413_v25, %v4072_v12 }
0x1521   :  { %v2494_v44 = vpop.xlane.xlu1 %2493 }
0x1522   :  { %v2498_v42 = vmul.f32 0.032258064, %v2494_v44 }
0x1524   :  { %3771 = vrsqrt.f32 %v2498_v42  ;;  %vm2502_vm4 = vcmp.eq.f32.partialorder %v2498_v42, inf  ;;  %v2505_v41 = vand.u32 2147483648, %v2498_v42  ;;  %vm2504_vm5 = vcmp.eq.f32.partialorder %v2498_v42, 0.0 }
0x1525   :  { %v2497_v23 = vpop.xlane.xlu1 %2496 }
0x1526   :  { %v2499_v39 = vmul.f32 0.032258064, %v2497_v23 }
0x1528   :  { %3773 = vrsqrt.f32 %v2499_v39  ;;  %vm2509_vm6 = vcmp.eq.f32.partialorder %v2499_v39, inf  ;;  %v2512_v50 = vand.u32 2147483648, %v2499_v39  ;;  %vm2511_vm7 = vcmp.eq.f32.partialorder %v2499_v39, 0.0 }
0x152e   :  { %v3772_v40 = vpop.eup %3771 }
0x152f   :  { %v2501_v37 = vmul.f32 %v3772_v40, %v2498_v42 }
0x1531   :  { %v2503_v45 = vsel %vm2502_vm4, %v2498_v42, %v2501_v37 }
0x1532   :  { %v3774_v48 = vpop.eup %3773  ;;  %v2506_v28 = vsel %vm2504_vm5, %v2505_v41, %v2503_v45 }
0x1533   :  { %v2508_v47 = vmul.f32 %v3774_v48, %v2499_v39  ;;  %v2520_v49 = vadd.f32 1e-06, %v2506_v28 }
0x1535   :  { %v2510_v1 = vsel %vm2509_vm6, %v2499_v39, %v2508_v47  ;;  %3775 = vrcp.f32 %v2520_v49 }
0x1536   :  { %v2513_v3 = vsel %vm2511_vm7, %v2512_v50, %v2510_v1  ;;  %v2754_v1 = vld [vmem:[%s4454_s2 + $0x20] sm:$0xff] }
0x1537   :  { %v2521_v51 = vadd.f32 1e-06, %v2513_v3  ;;  %v2755_v3 = vld [vmem:[%s4454_s2 + $0x50] sm:$0xff] }
0x1538   :  { %v3571_v52 = vpack.c.bf16 %v2755_v3, %v2754_v1 }
0x1539   :  { %3777 = vrcp.f32 %v2521_v51  ;;  %v2756_v51 = vld [vmem:[%s4454_s2 + $0x80] sm:$0xff] }
0x153a   :  { %3572 = vmatprep.subr.bf16.mxu1 %v3571_v52 }
0x153b   :  { %3574 = vmatpush3.bf16.msra.mxu1 %v3571_v52 }
0x153f   :  { %v3776_v54 = vpop.eup %3775 }
0x1540   :  { %v2523_v55 = vmul.f32 %v3776_v54, %v2518_v27 }
0x1542   :  { %v2530_v38 = vadd.f32 %v2529_v53, %v2523_v55 }
0x1543   :  { %v3778_v58 = vpop.eup %3777 }
0x1544   :  { %3314 = vmatprep.mubr.msk.f32.mxu0 %vm161_vm3, %v2530_v38  ;;  %v2525_v33 = vmul.f32 %v3778_v58, %v2519_v57 }
0x1546   :  { %v2531_v60 = vadd.f32 %v2529_v53, %v2525_v33  ;;  %v2757_v53 = vld [vmem:[%s4454_s2 + $0xb0] sm:$0xff] }
0x1547   :  { %v3575_v27 = vpack.c.bf16 %v2757_v53, %v2756_v51 }
0x1548   :  { %3315 = vmatmul.mubr.msk.f32.vlgmr.msra.gmra.mrb[18].mxu0 %vm161_vm3, %v2531_v60 }
0x1549   :  { %3542 = vmatpush3.bf16.msra.mxu0 %v3539_v36  ;;  %v2699_v36 = vrot.slane %v4413_v25, %v3935_v7  ;;  %3576 = vmatprep.subr.bf16.mxu1 %v3575_v27 }
0x154a   :  { %3544 = vmatprep.subr.bf16.mxu0 %v3543_v30  ;;  %3578 = vmatpush3.bf16.msra.mxu1 %v3575_v27 }
0x154d   :  { %3546 = vmatpush3.bf16.msra.mxu0 %v3543_v30 }
0x154e   :  { %3548 = vmatprep.subr.bf16.mxu0 %v3547_v63 }
0x1551   :  { %3550 = vmatpush3.bf16.msra.mxu0 %v3547_v63 }
0x1552   :  { %3552 = vmatprep.subr.bf16.mxu0 %v3551_v8 }
0x1555   :  { %3554 = vmatpush3.bf16.msra.mxu0 %v3551_v8 }
0x1556   :  { %3556 = vmatprep.subr.bf16.mxu0 %v3555_v46 }
0x1559   :  { %3558 = vmatpush3.bf16.msra.mxu0 %v3555_v46  ;;  %v2751_v46 = vrot.slane %v4413_v25, %v3955_v26 }
0x155a   :  { %3560 = vmatprep.subr.bf16.mxu0 %v3559_v43 }
0x155d   :  { %3562 = vmatpush3.bf16.msra.mxu0 %v3559_v43 }
0x155e   :  { %3564 = vmatprep.subr.bf16.mxu0 %v3563_v11 }
0x1561   :  { %3566 = vmatpush3.bf16.msra.mxu0 %v3563_v11 }
0x1562   :  { %3568 = vmatprep.subr.bf16.mxu0 %v3567_v24 }
0x1565   :  { %3570 = vmatpush3.bf16.msra.mxu0 %v3567_v24 }
0x161b   :  { %v3316_v22 = vpop.f32.mrb[18].mxu0 }
0x161c   :  { %v2614_v16 = vadd.f32 %v3316_v22, %v2535_v9  ;;  %v2608_v31 = vpop.f32.mrb[19].mxu0 }
0x161d   :  { %v2609_v19 = vadd.f32 %v2608_v31, %v2535_v9 }
0x161e   :  { %v2618_v34 = vmax.f32 %v2614_v16, 0.0 }
0x161f   :  { %v2617_v32 = vmax.f32 %v2609_v19, 0.0 }
0x1621   :  { %3349 = vmatprep.mubr.f32.mxu0 %v2617_v32 }
0x1622   :  { %3350 = vmatmul.mubr.f32.vlgmr.msra.gmra.mrb[20].mxu0 %v2618_v34 }
0x16f5   :  { %v3351_v35 = vpop.f32.mrb[20].mxu0 }
0x16f6   :  { %v2685_v44 = vpop.f32.mrb[21].mxu0  ;;  %v2695_v42 = vadd.f32 %v3351_v35, %v4332_v18 }
0x16f7   :  { %v2694_v23 = vadd.f32 %v2685_v44, %v4330_v10 }
0x16f8   :  { %v2701_v40 = vadd.f32 %v2699_v36, %v2695_v42 }
0x16f9   :  { %v2700_v39 = vadd.f32 %v2699_v36, %v2694_v23 }
0x16fa   :  { %v2705_v37 = vsel %vm161_vm3, %v2701_v40, 0.0 }
0x16fb   :  { %v2702_v2 = vsel %vm161_vm3, %v2700_v39, 0.0 }
0x16fc   :  { %2703 = vadd.xlane.f32.xlu1 %v2702_v2 }
0x1700   :  { %2706 = vadd.xlane.f32.xlu1 %v2705_v37 }
0x1789   :  { %v2704_v41 = vpop.xlane.xlu1 %2703 }
0x178a   :  { %v2708_v45 = vmul.f32 0.03125, %v2704_v41 }
0x178c   :  { %v2710_v48 = vsub.f32 %v2700_v39, %v2708_v45 }
0x178d   :  { %v2707_v28 = vpop.xlane.xlu1 %2706 }
0x178e   :  { %v2709_v47 = vmul.f32 0.03125, %v2707_v28  ;;  %v2712_v49 = vmul.f32 %v2710_v48, %v2710_v48  ;;  %v2740_v15 = vmul.f32 %v2739_v5, %v2710_v48 }
0x1790   :  { %v2711_v7 = vsub.f32 %v2701_v40, %v2709_v47  ;;  %v2714_v50 = vsel %vm161_vm3, %v2712_v49, 0.0 }
0x1791   :  { %2715 = vadd.xlane.f32.xlu0 %v2714_v50 }
0x1792   :  { %v2713_v18 = vmul.f32 %v2711_v7, %v2711_v7  ;;  %v2741_v43 = vmul.f32 %v2739_v5, %v2711_v7 }
0x1794   :  { %v2717_v10 = vsel %vm161_vm3, %v2713_v18, 0.0 }
0x1795   :  { %2718 = vadd.xlane.f32.xlu1 %v2717_v10 }
0x181e   :  { %v2716_v54 = vpop.xlane.xlu0 %2715 }
0x181f   :  { %v2720_v55 = vmul.f32 0.032258064, %v2716_v54 }
0x1821   :  { %3779 = vrsqrt.f32 %v2720_v55  ;;  %vm2724_vm8 = vcmp.eq.f32.partialorder %v2720_v55, inf  ;;  %v2727_v59 = vand.u32 2147483648, %v2720_v55  ;;  %vm2726_vm9 = vcmp.eq.f32.partialorder %v2720_v55, 0.0 }
0x1822   :  { %v2719_v57 = vpop.xlane.xlu1 %2718 }
0x1823   :  { %v2721_v38 = vmul.f32 0.032258064, %v2719_v57 }
0x1825   :  { %3781 = vrsqrt.f32 %v2721_v38  ;;  %vm2731_vm10 = vcmp.eq.f32.partialorder %v2721_v38, inf  ;;  %v2734_v63 = vand.u32 2147483648, %v2721_v38  ;;  %vm2733_vm11 = vcmp.eq.f32.partialorder %v2721_v38, 0.0 }
0x182b   :  { %v3780_v58 = vpop.eup %3779 }
0x182c   :  { %v2723_v4 = vmul.f32 %v3780_v58, %v2720_v55 }
0x182e   :  { %v2725_v33 = vsel %vm2724_vm8, %v2720_v55, %v2723_v4 }
0x182f   :  { %v3782_v60 = vpop.eup %3781  ;;  %v2728_v30 = vsel %vm2726_vm9, %v2727_v59, %v2725_v33 }
0x1830   :  { %v2742_v29 = vadd.f32 1e-06, %v2728_v30  ;;  %v2730_v56 = vmul.f32 %v3782_v60, %v2721_v38 }
0x1832   :  { %v2732_v0 = vsel %vm2731_vm10, %v2721_v38, %v2730_v56  ;;  %3783 = vrcp.f32 %v2742_v29 }
0x1833   :  { %v2735_v6 = vsel %vm2733_vm11, %v2734_v63, %v2732_v0 }
0x1834   :  { %v2743_v8 = vadd.f32 1e-06, %v2735_v6 }
0x1836   :  { %3785 = vrcp.f32 %v2743_v8 }
0x183c   :  { %v3784_v13 = vpop.eup %3783 }
0x183d   :  { %v2745_v14 = vmul.f32 %v3784_v13, %v2740_v15 }
0x183f   :  { %v2752_v17 = vadd.f32 %v2751_v46, %v2745_v14 }
0x1840   :  { %v3786_v61 = vpop.eup %3785 }
0x1841   :  { %v2747_v11 = vmul.f32 %v3786_v61, %v2741_v43  ;;  %3360 = vmatprep.mubr.msk.f32.mxu1 %vm161_vm3, %v2752_v17 }
0x1843   :  { %v2753_v62 = vadd.f32 %v2751_v46, %v2747_v11 }
0x1845   :  { %3361 = vmatmul.mubr.msk.f32.vlgmr.msra.gmra.mrb[18].mxu1 %vm161_vm3, %v2753_v62 }
0x1918   :  { %v3362_v24 = vpop.f32.mrb[18].mxu1 }
0x1919   :  { %v2834_v20 = vpop.f32.mrb[19].mxu1  ;;  %v2840_v22 = vadd.f32 %v3362_v24, %v2761_v21 }
0x191a   :  { %v2835_v9 = vadd.f32 %v2834_v20, %v2761_v21 }
0x191c   :  { %2843 = vmax.xlane.f32.xlu1 %v2835_v9 }
0x1920   :  { %2845 = vmax.xlane.f32.xlu1 %v2840_v22 }
0x19a9   :  { %v2844_v26 = vpop.xlane.xlu1 %2843 }
0x19aa   :  { %v2847_v16 = vsub.f32 %v2835_v9, %v2844_v26 }
0x19ac   :  { %v2849_v31 = vmul.f32 1.442695, %v2847_v16 }
0x19ad   :  { %v2846_v19 = vpop.xlane.xlu1 %2845 }
0x19ae   :  { %3787 = vpow2.f32 %v2849_v31  ;;  %v2848_v32 = vsub.f32 %v2840_v22, %v2846_v19 }
0x19b0   :  { %v2851_v34 = vmul.f32 1.442695, %v2848_v32 }
0x19b2   :  { %3789 = vpow2.f32 %v2851_v34 }
0x19b8   :  { %v3788_v35 = vpop.eup %3787 }
0x19b9   :  { %2853 = vadd.xlane.f32.xlu1 %v3788_v35 }
0x19bc   :  { %v3790_v36 = vpop.eup %3789 }
0x19bd   :  { %2855 = vadd.xlane.f32.xlu1 %v3790_v36 }
0x1a46   :  { %v2854_v44 = vpop.xlane.xlu1 %2853 }
0x1a47   :  { %3791 = vlog2.f32 %v2854_v44 }
0x1a4a   :  { %v2856_v12 = vpop.xlane.xlu1 %2855 }
0x1a4b   :  { %3793 = vlog2.f32 %v2856_v12 }
0x1a51   :  { %v3792_v25 = vpop.eup %3791 }
0x1a52   :  { %v2858_v42 = vmul.f32 0.6931472, %v3792_v25 }
0x1a54   :  { %v2861_v23 = vsub.f32 %v2847_v16, %v2858_v42 }
0x1a55   :  { %v3794_v39 = vpop.eup %3793 }
0x1a56   :  { %2863 = vst [vmem:[%s4456_s5] sm:$0xff] %v2861_v23  ;;  %v2860_v2 = vmul.f32 0.6931472, %v3794_v39 }
0x1a58   :  { %v2862_v40 = vsub.f32 %v2848_v32, %v2860_v2 }
0x1a5a   :  { %2864 = vst [vmem:[%s4456_s5 + $0x8] sm:$0xff] %v2862_v40 }

</bundles_post_ra>
